<compile_context>
chip_gen: v6e
topology: v6e:2x2x1
jax: 0.10.0
libtpu: 0.0.40
codegen_flags: <defaults>
</compile_context>

<pallas_src>
import functools
import math

import jax
import jax.numpy as jnp
from jax.experimental import pallas as pl
from jax.experimental.pallas import tpu as pltpu


def _mha_kernel(lens_ref,
                q_ref, k_ref, v_ref,
                wq_ref, bq_ref, wk_ref, bk_ref, wv_ref, bv_ref,
                wo_ref, bo_ref,
                o_ref, acc_ref,
                *, scale, bt, seq, head_dim, heads_per_step):
    g = pl.program_id(1)
    ng = pl.num_programs(1)
    d_model = q_ref.shape[-1]
    hw = heads_per_step * head_dim          # head-group width
    rows = bt * seq

    # ---- head-group weight slices (weights are VMEM-resident; leading-dim index) ----
    wq_blk = wq_ref[g]                      # (D, hw)  bf16
    wk_blk = wk_ref[g]
    wv_blk = wv_ref[g]
    wo_blk = wo_ref[g]                      # (hw, D)  bf16
    bq_blk = bq_ref[g]                      # (1, hw)  f32
    bk_blk = bk_ref[g]
    bv_blk = bv_ref[g]

    # ---- projections on the flattened (bt*L, D) activation tile (bf16 -> MXU) ----
    qf = q_ref[...].reshape(rows, d_model)
    kf = k_ref[...].reshape(rows, d_model)
    vf = v_ref[...].reshape(rows, d_model)

    qh = jnp.dot(qf, wq_blk, preferred_element_type=jnp.float32) + bq_blk
    qh = qh * scale                         # fold 1/sqrt(hd) into the small tile
    kh = jnp.dot(kf, wk_blk, preferred_element_type=jnp.float32) + bk_blk
    vh = (jnp.dot(vf, wv_blk, preferred_element_type=jnp.float32)
          + bv_blk).astype(jnp.bfloat16)

    # ---- attention per (batch row, head in group); all math in f32 ----
    ctx_rows = []
    for bi in range(bt):
        b_glob = pl.program_id(0) * bt + bi
        klen = lens_ref[b_glob]
        key_idx = jax.lax.broadcasted_iota(jnp.int32, (1, seq), 1)
        bias = jnp.where(key_idx >= klen, jnp.float32(-1e9), jnp.float32(0.0))

        r0 = bi * seq
        head_ctx = []
        for hi in range(heads_per_step):
            c0 = hi * head_dim
            qt = qh[r0:r0 + seq, c0:c0 + head_dim]
            kt = kh[r0:r0 + seq, c0:c0 + head_dim]
            vt = vh[r0:r0 + seq, c0:c0 + head_dim]

            scores = jax.lax.dot_general(
                qt, kt, (((1,), (1,)), ((), ())),
                preferred_element_type=jnp.float32)
            scores = scores + bias          # additive key-padding mask (O(L) build)

            m = jnp.max(scores, axis=-1, keepdims=True)
            e = jnp.exp(scores - m)
            s = jnp.sum(e, axis=-1, keepdims=True)
            # deferred normalization: scale the (L, hd) result, not the (L, L) probs
            ctx = jnp.dot(e.astype(jnp.bfloat16), vt,
                          preferred_element_type=jnp.float32)
            ctx = ctx * pl.reciprocal(s, approx=True)
            head_ctx.append(ctx)
        ctx_rows.append(jnp.concatenate(head_ctx, axis=-1)
                        if heads_per_step > 1 else head_ctx[0])
    ctx_all = jnp.concatenate(ctx_rows, axis=0) if bt > 1 else ctx_rows[0]

    # ---- output projection decomposed over head groups, f32 accumulator ----
    @pl.when(g == 0)
    def _():
        acc_ref[...] = jnp.zeros_like(acc_ref)

    acc_ref[...] += jnp.dot(ctx_all.astype(jnp.bfloat16), wo_blk,
                            preferred_element_type=jnp.float32)

    @pl.when(g == ng - 1)
    def _():
        out = acc_ref[...] + bo_ref[...]
        o_ref[...] = out.reshape(bt, seq, d_model).astype(o_ref.dtype)


def multi_head_attention(q, k, v, wq, bq, wk, bk, wv, bv, wo, bo, *,
                         num_heads, key_lens=None):
    """Fused MHA forward.

    q/k/v: [B, L, D]; weights [D, D] applied as x @ W + b (math layout).
    key_lens: optional [B] int32 number of valid keys per batch row; keys at
      positions >= key_lens[b] are masked (standard padding mask).  None = no mask.
    """
    B, L, D = q.shape
    assert k.shape == (B, L, D) and v.shape == (B, L, D)
    assert D % num_heads == 0
    head_dim = D // num_heads
    assert L % 8 == 0, "seq length must be a multiple of 8 (sublane tiling)"
    assert D % 128 == 0, "d_model must be a multiple of 128 (lane tiling)"

    # Heads per grid step: fill the 256-wide MXU on v6e/v7x when head_dim <= 128.
    heads_per_step = 1
    for cand in range(num_heads, 0, -1):
        if num_heads % cand == 0 and cand * head_dim <= 256:
            heads_per_step = cand
            break
    num_groups = num_heads // heads_per_step
    hw = heads_per_step * head_dim

    # Batch rows per step so the projection M dimension isn't tiny when L is small.
    bt = 1
    for cand in range(min(B, max(1, 256 // L)), 0, -1):
        if B % cand == 0:
            bt = cand
            break

    if key_lens is None:
        key_lens = jnp.full((B,), L, dtype=jnp.int32)
    else:
        key_lens = key_lens.astype(jnp.int32)

    # bf16 operands for the MXU; f32 biases / accumulation / softmax.
    cdt = jnp.bfloat16
    qc, kc, vc = (x.astype(cdt) for x in (q, k, v))
    # Pre-reshape weights so each head group is a leading-axis slice (resident in VMEM).
    wq_g = wq.astype(cdt).reshape(D, num_groups, hw).transpose(1, 0, 2)  # (ng, D, hw)
    wk_g = wk.astype(cdt).reshape(D, num_groups, hw).transpose(1, 0, 2)
    wv_g = wv.astype(cdt).reshape(D, num_groups, hw).transpose(1, 0, 2)
    wo_g = wo.astype(cdt).reshape(num_groups, hw, D)                     # (ng, hw, D)
    bq_g = bq.astype(jnp.float32).reshape(num_groups, 1, hw)
    bk_g = bk.astype(jnp.float32).reshape(num_groups, 1, hw)
    bv_g = bv.astype(jnp.float32).reshape(num_groups, 1, hw)
    bo2 = bo.astype(jnp.float32).reshape(1, D)

    scale = 1.0 / math.sqrt(head_dim)
    kernel = functools.partial(_mha_kernel, scale=scale, bt=bt, seq=L,
                               head_dim=head_dim, heads_per_step=heads_per_step)

    flops = 8 * B * L * D * D + 4 * B * L * L * D
    transcendentals = B * num_heads * L * L
    bytes_accessed = 2 * (3 * B * L * D + 4 * D * D) + 4 * (B * L * D + 4 * D + B)

    # Rough per-step working set; only raise the scoped-VMEM limit when needed.
    weight_bytes = 2 * (4 * D * D * 2)                   # resident bf16 weights (2 bufs)
    act_bytes = (3 * 2 * bt * L * D * 2                  # q/k/v bf16, double-buffered
                 + 2 * bt * L * D * 4                    # out f32, double-buffered
                 + bt * L * D * 4)                       # f32 accumulator scratch
    vmem_need = weight_bytes + act_bytes
    compiler_kwargs = dict(dimension_semantics=("parallel", "arbitrary"))
    if vmem_need > 32 * 1024 * 1024:
        compiler_kwargs["vmem_limit_bytes"] = int(min(vmem_need * 5 // 4,
                                                      100 * 1024 * 1024))

    grid = (B // bt, num_groups)

    out = pl.pallas_call(
        kernel,
        out_shape=jax.ShapeDtypeStruct((B, L, D), q.dtype),
        grid_spec=pltpu.PrefetchScalarGridSpec(
            num_scalar_prefetch=1,
            grid=grid,
            in_specs=[
                pl.BlockSpec((bt, L, D), lambda b, g, lens: (b, 0, 0)),          # q
                pl.BlockSpec((bt, L, D), lambda b, g, lens: (b, 0, 0)),          # k
                pl.BlockSpec((bt, L, D), lambda b, g, lens: (b, 0, 0)),          # v
                pl.BlockSpec((num_groups, D, hw), lambda b, g, lens: (0, 0, 0)),  # Wq (resident)
                pl.BlockSpec((num_groups, 1, hw), lambda b, g, lens: (0, 0, 0)),  # bq
                pl.BlockSpec((num_groups, D, hw), lambda b, g, lens: (0, 0, 0)),  # Wk
                pl.BlockSpec((num_groups, 1, hw), lambda b, g, lens: (0, 0, 0)),  # bk
                pl.BlockSpec((num_groups, D, hw), lambda b, g, lens: (0, 0, 0)),  # Wv
                pl.BlockSpec((num_groups, 1, hw), lambda b, g, lens: (0, 0, 0)),  # bv
                pl.BlockSpec((num_groups, hw, D), lambda b, g, lens: (0, 0, 0)),  # Wo (resident)
                pl.BlockSpec((1, D), lambda b, g, lens: (0, 0)),                  # bo
            ],
            out_specs=pl.BlockSpec((bt, L, D), lambda b, g, lens: (b, 0, 0)),
            scratch_shapes=[pltpu.VMEM((bt * L, D), jnp.float32)],
        ),
        compiler_params=pltpu.CompilerParams(**compiler_kwargs),
        cost_estimate=pl.CostEstimate(
            flops=flops, transcendentals=transcendentals,
            bytes_accessed=bytes_accessed),
    )(key_lens, qc, kc, vc, wq_g, bq_g, wk_g, bk_g, wv_g, bv_g, wo_g, bo2)
    return out


def _reference(q, k, v, mask, wq, bq, wk, bk, wv, bv, wo, bo, num_heads):
    B, L, D = q.shape
    hd = D // num_heads

    def split_heads(x):
        return x.reshape(B, L, num_heads, hd).transpose(0, 2, 1, 3)

    Q = split_heads(jnp.dot(q, wq) + bq)
    K = split_heads(jnp.dot(k, wk) + bk)
    V = split_heads(jnp.dot(v, wv) + bv)

    scores = jnp.einsum('bhqd,bhkd->bhqk', Q, K) / math.sqrt(hd)
    if mask is not None:
        scores = jnp.where(mask[:, None, :, :] != 0, jnp.float32(-1e9), scores)
    p = jax.nn.softmax(scores, axis=-1)
    ctx = jnp.einsum('bhqk,bhkd->bhqd', p, V)
    ctx = ctx.transpose(0, 2, 1, 3).reshape(B, L, D)
    return jnp.dot(ctx, wo) + bo


if __name__ == "__main__":
    # Small but lane-dense shapes: batch=2, seq=16, d_model=256, heads=2 (head_dim=128).
    B, L, D, H = 2, 16, 256, 2
    key = jax.random.PRNGKey(0)
    ks = jax.random.split(key, 11)

    q = jax.random.normal(ks[0], (B, L, D), dtype=jnp.float32)
    k = jax.random.normal(ks[1], (B, L, D), dtype=jnp.float32)
    v = jax.random.normal(ks[2], (B, L, D), dtype=jnp.float32)

    sc = 1.0 / math.sqrt(D)
    wq = jax.random.normal(ks[3], (D, D), dtype=jnp.float32) * sc
    bq = jax.random.normal(ks[4], (D,), dtype=jnp.float32) * 0.1
    wk = jax.random.normal(ks[5], (D, D), dtype=jnp.float32) * sc
    bk = jax.random.normal(ks[6], (D,), dtype=jnp.float32) * 0.1
    wv = jax.random.normal(ks[7], (D, D), dtype=jnp.float32) * sc
    bv = jax.random.normal(ks[8], (D,), dtype=jnp.float32) * 0.1
    wo = jax.random.normal(ks[9], (D, D), dtype=jnp.float32) * sc
    bo = jax.random.normal(ks[10], (D,), dtype=jnp.float32) * 0.1

    # Key-padding mask: batch 0 fully visible, batch 1 masks the last 5 keys.
    key_lens = jnp.array([L, L - 5], dtype=jnp.int32)

    out = multi_head_attention(q, k, v, wq, bq, wk, bk, wv, bv, wo, bo,
                               num_heads=H, key_lens=key_lens)
    out = jax.block_until_ready(out)
    assert out.shape == (B, L, D)

    # Dense mask equivalent of key_lens, for the references.
    cols = jnp.arange(L, dtype=jnp.int32)[None, None, :]
    mask = jnp.broadcast_to(cols >= key_lens[:, None, None], (B, L, L)).astype(jnp.int32)

    # (a) tight-ish check vs a reference fed the same bf16-rounded operands
    #     (isolates kernel correctness from the deliberate bf16 MXU feed).
    to_bf = lambda x: x.astype(jnp.bfloat16).astype(jnp.float32)
    ref_bf16 = _reference(to_bf(q), to_bf(k), to_bf(v), mask,
                          to_bf(wq), bq, to_bf(wk), bk, to_bf(wv), bv,
                          to_bf(wo), bo, H)
    assert jnp.allclose(out, ref_bf16, atol=1e-2, rtol=1e-2), \
        "mismatch vs bf16-matched reference"

    # (b) loose check vs the full-f32 reference (bf16 quantization tolerance).
    ref_f32 = _reference(q, k, v, mask, wq, bq, wk, bk, wv, bv, wo, bo, H)
    assert jnp.allclose(out, ref_f32, atol=5e-2, rtol=5e-2), \
        "mismatch vs f32 reference"

    print("KERNEL_OK")
</pallas_src>

<mosaic_0001>
module attributes {stable_mosaic.version = 11 : i64} {
  func.func @_mha_kernel(%arg0: i32, %arg1: i32, %arg2: memref<2xi32, #tpu.memory_space<smem>>, %arg3: memref<2x16x256xbf16, #tpu.memory_space<vmem>>, %arg4: memref<2x16x256xbf16, #tpu.memory_space<vmem>>, %arg5: memref<2x16x256xbf16, #tpu.memory_space<vmem>>, %arg6: memref<1x256x256xbf16, #tpu.memory_space<vmem>>, %arg7: memref<1x1x256xf32, #tpu.memory_space<vmem>>, %arg8: memref<1x256x256xbf16, #tpu.memory_space<vmem>>, %arg9: memref<1x1x256xf32, #tpu.memory_space<vmem>>, %arg10: memref<1x256x256xbf16, #tpu.memory_space<vmem>>, %arg11: memref<1x1x256xf32, #tpu.memory_space<vmem>>, %arg12: memref<1x256x256xbf16, #tpu.memory_space<vmem>>, %arg13: memref<1x256xf32, #tpu.memory_space<vmem>>, %arg14: memref<2x16x256xf32, #tpu.memory_space<vmem>>, %arg15: memref<32x256xf32, #tpu.memory_space<vmem>>) attributes {dimension_semantics = [#tpu.dimension_semantics<parallel>, #tpu.dimension_semantics<arbitrary>], iteration_bounds = array<i64: 1, 1>, scalar_prefetch = 1 : i64, scratch_operands = 1 : i64, tpu.core_type = #tpu.core_type<tc>, window_params = [{transform_indices = @transform_0, window_bounds = array<i64: 2, 16, 256>}, {transform_indices = @transform_1, window_bounds = array<i64: 2, 16, 256>}, {transform_indices = @transform_2, window_bounds = array<i64: 2, 16, 256>}, {pipeline_mode = #tpu.pipeline_mode<synchronous>, transform_indices = @transform_3, window_bounds = array<i64: 1, 256, 256>}, {pipeline_mode = #tpu.pipeline_mode<synchronous>, transform_indices = @transform_4, window_bounds = array<i64: 1, 1, 256>}, {pipeline_mode = #tpu.pipeline_mode<synchronous>, transform_indices = @transform_5, window_bounds = array<i64: 1, 256, 256>}, {pipeline_mode = #tpu.pipeline_mode<synchronous>, transform_indices = @transform_6, window_bounds = array<i64: 1, 1, 256>}, {pipeline_mode = #tpu.pipeline_mode<synchronous>, transform_indices = @transform_7, window_bounds = array<i64: 1, 256, 256>}, {pipeline_mode = #tpu.pipeline_mode<synchronous>, transform_indices = @transform_8, window_bounds = array<i64: 1, 1, 256>}, {pipeline_mode = #tpu.pipeline_mode<synchronous>, transform_indices = @transform_9, window_bounds = array<i64: 1, 256, 256>}, {pipeline_mode = #tpu.pipeline_mode<synchronous>, transform_indices = @transform_10, window_bounds = array<i64: 1, 256>}, {transform_indices = @transform_11, window_bounds = array<i64: 2, 16, 256>}]} {
    %0 = arith.index_cast %arg1 : i32 to index
    %c0 = arith.constant 0 : index
    %c0_0 = arith.constant 0 : index
    %1 = vector.load %arg6[%0, %c0, %c0_0] : memref<1x256x256xbf16, #tpu.memory_space<vmem>>, vector<1x256x256xbf16>
    %2 = vector.shape_cast %1 : vector<1x256x256xbf16> to vector<256x256xbf16>
    %3 = arith.index_cast %arg1 : i32 to index
    %c0_1 = arith.constant 0 : index
    %c0_2 = arith.constant 0 : index
    %4 = vector.load %arg8[%3, %c0_1, %c0_2] : memref<1x256x256xbf16, #tpu.memory_space<vmem>>, vector<1x256x256xbf16>
    %5 = vector.shape_cast %4 : vector<1x256x256xbf16> to vector<256x256xbf16>
    %6 = arith.index_cast %arg1 : i32 to index
    %c0_3 = arith.constant 0 : index
    %c0_4 = arith.constant 0 : index
    %7 = vector.load %arg10[%6, %c0_3, %c0_4] : memref<1x256x256xbf16, #tpu.memory_space<vmem>>, vector<1x256x256xbf16>
    %8 = vector.shape_cast %7 : vector<1x256x256xbf16> to vector<256x256xbf16>
    %9 = arith.index_cast %arg1 : i32 to index
    %c0_5 = arith.constant 0 : index
    %c0_6 = arith.constant 0 : index
    %10 = vector.load %arg12[%9, %c0_5, %c0_6] : memref<1x256x256xbf16, #tpu.memory_space<vmem>>, vector<1x256x256xbf16>
    %11 = vector.shape_cast %10 : vector<1x256x256xbf16> to vector<256x256xbf16>
    %12 = arith.index_cast %arg1 : i32 to index
    %c0_7 = arith.constant 0 : index
    %c0_8 = arith.constant 0 : index
    %13 = vector.load %arg7[%12, %c0_7, %c0_8] : memref<1x1x256xf32, #tpu.memory_space<vmem>>, vector<1x1x256xf32>
    %14 = vector.shape_cast %13 : vector<1x1x256xf32> to vector<1x256xf32>
    %15 = arith.index_cast %arg1 : i32 to index
    %c0_9 = arith.constant 0 : index
    %c0_10 = arith.constant 0 : index
    %16 = vector.load %arg9[%15, %c0_9, %c0_10] : memref<1x1x256xf32, #tpu.memory_space<vmem>>, vector<1x1x256xf32>
    %17 = vector.shape_cast %16 : vector<1x1x256xf32> to vector<1x256xf32>
    %18 = arith.index_cast %arg1 : i32 to index
    %c0_11 = arith.constant 0 : index
    %c0_12 = arith.constant 0 : index
    %19 = vector.load %arg11[%18, %c0_11, %c0_12] : memref<1x1x256xf32, #tpu.memory_space<vmem>>, vector<1x1x256xf32>
    %20 = vector.shape_cast %19 : vector<1x1x256xf32> to vector<1x256xf32>
    %c0_13 = arith.constant 0 : index
    %c0_14 = arith.constant 0 : index
    %c0_15 = arith.constant 0 : index
    %21 = vector.load %arg3[%c0_13, %c0_14, %c0_15] : memref<2x16x256xbf16, #tpu.memory_space<vmem>>, vector<2x16x256xbf16>
    %22 = vector.shape_cast %21 : vector<2x16x256xbf16> to vector<32x256xbf16>
    %c0_16 = arith.constant 0 : index
    %c0_17 = arith.constant 0 : index
    %c0_18 = arith.constant 0 : index
    %23 = vector.load %arg4[%c0_16, %c0_17, %c0_18] : memref<2x16x256xbf16, #tpu.memory_space<vmem>>, vector<2x16x256xbf16>
    %24 = vector.shape_cast %23 : vector<2x16x256xbf16> to vector<32x256xbf16>
    %c0_19 = arith.constant 0 : index
    %c0_20 = arith.constant 0 : index
    %c0_21 = arith.constant 0 : index
    %25 = vector.load %arg5[%c0_19, %c0_20, %c0_21] : memref<2x16x256xbf16, #tpu.memory_space<vmem>>, vector<2x16x256xbf16>
    %26 = vector.shape_cast %25 : vector<2x16x256xbf16> to vector<32x256xbf16>
    %cst = arith.constant dense<0.000000e+00> : vector<32x256xf32>
    %27 = tpu.matmul %22, %2, %cst {dimension_numbers = #tpu.dot_dimension_numbers<[1], [0], [0], [1], [0, 0, 1, 1], [], []>} : vector<32x256xbf16>, vector<256x256xbf16>, vector<32x256xf32> -> vector<32x256xf32>
    %28 = vector.broadcast %14 : vector<1x256xf32> to vector<32x256xf32>
    %29 = arith.addf %27, %28 : vector<32x256xf32>
    %cst_22 = arith.constant 0.0883883461 : f32
    %30 = vector.broadcast %cst_22 : f32 to vector<32x256xf32>
    %31 = arith.mulf %29, %30 : vector<32x256xf32>
    %cst_23 = arith.constant dense<0.000000e+00> : vector<32x256xf32>
    %32 = tpu.matmul %24, %5, %cst_23 {dimension_numbers = #tpu.dot_dimension_numbers<[1], [0], [0], [1], [0, 0, 1, 1], [], []>} : vector<32x256xbf16>, vector<256x256xbf16>, vector<32x256xf32> -> vector<32x256xf32>
    %33 = vector.broadcast %17 : vector<1x256xf32> to vector<32x256xf32>
    %34 = arith.addf %32, %33 : vector<32x256xf32>
    %cst_24 = arith.constant dense<0.000000e+00> : vector<32x256xf32>
    %35 = tpu.matmul %26, %8, %cst_24 {dimension_numbers = #tpu.dot_dimension_numbers<[1], [0], [0], [1], [0, 0, 1, 1], [], []>} : vector<32x256xbf16>, vector<256x256xbf16>, vector<32x256xf32> -> vector<32x256xf32>
    %36 = vector.broadcast %20 : vector<1x256xf32> to vector<32x256xf32>
    %37 = arith.addf %35, %36 : vector<32x256xf32>
    %38 = arith.truncf %37 : vector<32x256xf32> to vector<32x256xbf16>
    %c2_i32 = arith.constant 2 : i32
    %39 = arith.muli %arg0, %c2_i32 : i32
    %c0_i32 = arith.constant 0 : i32
    %40 = arith.addi %39, %c0_i32 : i32
    %41 = arith.index_cast %40 : i32 to index
    %42 = memref.load %arg2[%41] : memref<2xi32, #tpu.memory_space<smem>>
    %43 = tpu.iota {dimensions = array<i32: 1>} : vector<1x16xi32>
    %44 = vector.broadcast %42 : i32 to vector<1x16xi32>
    %45 = arith.cmpi sge, %43, %44 : vector<1x16xi32>
    %cst_25 = arith.constant -1.000000e+09 : f32
    %cst_26 = arith.constant 0.000000e+00 : f32
    %46 = vector.broadcast %cst_25 : f32 to vector<1x16xf32>
    %47 = vector.broadcast %cst_26 : f32 to vector<1x16xf32>
    %48 = arith.select %45, %46, %47 : vector<1x16xi1>, vector<1x16xf32>
    %49 = vector.extract_strided_slice %31 {offsets = [0, 0], sizes = [16, 128], strides = [1, 1]} : vector<32x256xf32> to vector<16x128xf32>
    %50 = vector.extract_strided_slice %34 {offsets = [0, 0], sizes = [16, 128], strides = [1, 1]} : vector<32x256xf32> to vector<16x128xf32>
    %51 = vector.extract_strided_slice %38 {offsets = [0, 0], sizes = [16, 128], strides = [1, 1]} : vector<32x256xbf16> to vector<16x128xbf16>
    %cst_27 = arith.constant dense<0.000000e+00> : vector<16x16xf32>
    %52 = tpu.matmul %49, %50, %cst_27 {dimension_numbers = #tpu.dot_dimension_numbers<[1], [1], [0], [0], [0, 0, 1, 0], [], []>} : vector<16x128xf32>, vector<16x128xf32>, vector<16x16xf32> -> vector<16x16xf32>
    %53 = vector.broadcast %48 : vector<1x16xf32> to vector<16x16xf32>
    %54 = arith.addf %52, %53 : vector<16x16xf32>
    %cst_28 = arith.constant dense<0xFF800000> : vector<16xf32>
    %55 = vector.multi_reduction <maximumf>, %54, %cst_28 [1] : vector<16x16xf32> to vector<16xf32>
    %56 = vector.shape_cast %55 : vector<16xf32> to vector<16x1xf32>
    %57 = vector.broadcast %56 : vector<16x1xf32> to vector<16x16xf32>
    %58 = arith.subf %54, %57 : vector<16x16xf32>
    %59 = math.exp %58 : vector<16x16xf32>
    %cst_29 = arith.constant dense<0.000000e+00> : vector<16xf32>
    %60 = vector.multi_reduction <add>, %59, %cst_29 [1] : vector<16x16xf32> to vector<16xf32>
    %61 = vector.shape_cast %60 : vector<16xf32> to vector<16x1xf32>
    %62 = arith.truncf %59 : vector<16x16xf32> to vector<16x16xbf16>
    %cst_30 = arith.constant dense<0.000000e+00> : vector<16x128xf32>
    %63 = tpu.matmul %62, %51, %cst_30 {dimension_numbers = #tpu.dot_dimension_numbers<[1], [0], [0], [1], [0, 0, 1, 1], [], []>} : vector<16x16xbf16>, vector<16x128xbf16>, vector<16x128xf32> -> vector<16x128xf32>
    %64 = tpu.reciprocal %61 {approx = true} : vector<16x1xf32> -> vector<16x1xf32>
    %65 = vector.broadcast %64 : vector<16x1xf32> to vector<16x128xf32>
    %66 = arith.mulf %63, %65 : vector<16x128xf32>
    %67 = vector.extract_strided_slice %31 {offsets = [0, 128], sizes = [16, 128], strides = [1, 1]} : vector<32x256xf32> to vector<16x128xf32>
    %68 = vector.extract_strided_slice %34 {offsets = [0, 128], sizes = [16, 128], strides = [1, 1]} : vector<32x256xf32> to vector<16x128xf32>
    %69 = vector.extract_strided_slice %38 {offsets = [0, 128], sizes = [16, 128], strides = [1, 1]} : vector<32x256xbf16> to vector<16x128xbf16>
    %cst_31 = arith.constant dense<0.000000e+00> : vector<16x16xf32>
    %70 = tpu.matmul %67, %68, %cst_31 {dimension_numbers = #tpu.dot_dimension_numbers<[1], [1], [0], [0], [0, 0, 1, 0], [], []>} : vector<16x128xf32>, vector<16x128xf32>, vector<16x16xf32> -> vector<16x16xf32>
    %71 = vector.broadcast %48 : vector<1x16xf32> to vector<16x16xf32>
    %72 = arith.addf %70, %71 : vector<16x16xf32>
    %cst_32 = arith.constant dense<0xFF800000> : vector<16xf32>
    %73 = vector.multi_reduction <maximumf>, %72, %cst_32 [1] : vector<16x16xf32> to vector<16xf32>
    %74 = vector.shape_cast %73 : vector<16xf32> to vector<16x1xf32>
    %75 = vector.broadcast %74 : vector<16x1xf32> to vector<16x16xf32>
    %76 = arith.subf %72, %75 : vector<16x16xf32>
    %77 = math.exp %76 : vector<16x16xf32>
    %cst_33 = arith.constant dense<0.000000e+00> : vector<16xf32>
    %78 = vector.multi_reduction <add>, %77, %cst_33 [1] : vector<16x16xf32> to vector<16xf32>
    %79 = vector.shape_cast %78 : vector<16xf32> to vector<16x1xf32>
    %80 = arith.truncf %77 : vector<16x16xf32> to vector<16x16xbf16>
    %cst_34 = arith.constant dense<0.000000e+00> : vector<16x128xf32>
    %81 = tpu.matmul %80, %69, %cst_34 {dimension_numbers = #tpu.dot_dimension_numbers<[1], [0], [0], [1], [0, 0, 1, 1], [], []>} : vector<16x16xbf16>, vector<16x128xbf16>, vector<16x128xf32> -> vector<16x128xf32>
    %82 = tpu.reciprocal %79 {approx = true} : vector<16x1xf32> -> vector<16x1xf32>
    %83 = vector.broadcast %82 : vector<16x1xf32> to vector<16x128xf32>
    %84 = arith.mulf %81, %83 : vector<16x128xf32>
    %85 = tpu.concatenate %66, %84 in 1 : vector<16x128xf32>, vector<16x128xf32> -> vector<16x256xf32>
    %c2_i32_35 = arith.constant 2 : i32
    %86 = arith.muli %arg0, %c2_i32_35 : i32
    %c1_i32 = arith.constant 1 : i32
    %87 = arith.addi %86, %c1_i32 : i32
    %88 = arith.index_cast %87 : i32 to index
    %89 = memref.load %arg2[%88] : memref<2xi32, #tpu.memory_space<smem>>
    %90 = tpu.iota {dimensions = array<i32: 1>} : vector<1x16xi32>
    %91 = vector.broadcast %89 : i32 to vector<1x16xi32>
    %92 = arith.cmpi sge, %90, %91 : vector<1x16xi32>
    %cst_36 = arith.constant -1.000000e+09 : f32
    %cst_37 = arith.constant 0.000000e+00 : f32
    %93 = vector.broadcast %cst_36 : f32 to vector<1x16xf32>
    %94 = vector.broadcast %cst_37 : f32 to vector<1x16xf32>
    %95 = arith.select %92, %93, %94 : vector<1x16xi1>, vector<1x16xf32>
    %96 = vector.extract_strided_slice %31 {offsets = [16, 0], sizes = [16, 128], strides = [1, 1]} : vector<32x256xf32> to vector<16x128xf32>
    %97 = vector.extract_strided_slice %34 {offsets = [16, 0], sizes = [16, 128], strides = [1, 1]} : vector<32x256xf32> to vector<16x128xf32>
    %98 = vector.extract_strided_slice %38 {offsets = [16, 0], sizes = [16, 128], strides = [1, 1]} : vector<32x256xbf16> to vector<16x128xbf16>
    %cst_38 = arith.constant dense<0.000000e+00> : vector<16x16xf32>
    %99 = tpu.matmul %96, %97, %cst_38 {dimension_numbers = #tpu.dot_dimension_numbers<[1], [1], [0], [0], [0, 0, 1, 0], [], []>} : vector<16x128xf32>, vector<16x128xf32>, vector<16x16xf32> -> vector<16x16xf32>
    %100 = vector.broadcast %95 : vector<1x16xf32> to vector<16x16xf32>
    %101 = arith.addf %99, %100 : vector<16x16xf32>
    %cst_39 = arith.constant dense<0xFF800000> : vector<16xf32>
    %102 = vector.multi_reduction <maximumf>, %101, %cst_39 [1] : vector<16x16xf32> to vector<16xf32>
    %103 = vector.shape_cast %102 : vector<16xf32> to vector<16x1xf32>
    %104 = vector.broadcast %103 : vector<16x1xf32> to vector<16x16xf32>
    %105 = arith.subf %101, %104 : vector<16x16xf32>
    %106 = math.exp %105 : vector<16x16xf32>
    %cst_40 = arith.constant dense<0.000000e+00> : vector<16xf32>
    %107 = vector.multi_reduction <add>, %106, %cst_40 [1] : vector<16x16xf32> to vector<16xf32>
    %108 = vector.shape_cast %107 : vector<16xf32> to vector<16x1xf32>
    %109 = arith.truncf %106 : vector<16x16xf32> to vector<16x16xbf16>
    %cst_41 = arith.constant dense<0.000000e+00> : vector<16x128xf32>
    %110 = tpu.matmul %109, %98, %cst_41 {dimension_numbers = #tpu.dot_dimension_numbers<[1], [0], [0], [1], [0, 0, 1, 1], [], []>} : vector<16x16xbf16>, vector<16x128xbf16>, vector<16x128xf32> -> vector<16x128xf32>
    %111 = tpu.reciprocal %108 {approx = true} : vector<16x1xf32> -> vector<16x1xf32>
    %112 = vector.broadcast %111 : vector<16x1xf32> to vector<16x128xf32>
    %113 = arith.mulf %110, %112 : vector<16x128xf32>
    %114 = vector.extract_strided_slice %31 {offsets = [16, 128], sizes = [16, 128], strides = [1, 1]} : vector<32x256xf32> to vector<16x128xf32>
    %115 = vector.extract_strided_slice %34 {offsets = [16, 128], sizes = [16, 128], strides = [1, 1]} : vector<32x256xf32> to vector<16x128xf32>
    %116 = vector.extract_strided_slice %38 {offsets = [16, 128], sizes = [16, 128], strides = [1, 1]} : vector<32x256xbf16> to vector<16x128xbf16>
    %cst_42 = arith.constant dense<0.000000e+00> : vector<16x16xf32>
    %117 = tpu.matmul %114, %115, %cst_42 {dimension_numbers = #tpu.dot_dimension_numbers<[1], [1], [0], [0], [0, 0, 1, 0], [], []>} : vector<16x128xf32>, vector<16x128xf32>, vector<16x16xf32> -> vector<16x16xf32>
    %118 = vector.broadcast %95 : vector<1x16xf32> to vector<16x16xf32>
    %119 = arith.addf %117, %118 : vector<16x16xf32>
    %cst_43 = arith.constant dense<0xFF800000> : vector<16xf32>
    %120 = vector.multi_reduction <maximumf>, %119, %cst_43 [1] : vector<16x16xf32> to vector<16xf32>
    %121 = vector.shape_cast %120 : vector<16xf32> to vector<16x1xf32>
    %122 = vector.broadcast %121 : vector<16x1xf32> to vector<16x16xf32>
    %123 = arith.subf %119, %122 : vector<16x16xf32>
    %124 = math.exp %123 : vector<16x16xf32>
    %cst_44 = arith.constant dense<0.000000e+00> : vector<16xf32>
    %125 = vector.multi_reduction <add>, %124, %cst_44 [1] : vector<16x16xf32> to vector<16xf32>
    %126 = vector.shape_cast %125 : vector<16xf32> to vector<16x1xf32>
    %127 = arith.truncf %124 : vector<16x16xf32> to vector<16x16xbf16>
    %cst_45 = arith.constant dense<0.000000e+00> : vector<16x128xf32>
    %128 = tpu.matmul %127, %116, %cst_45 {dimension_numbers = #tpu.dot_dimension_numbers<[1], [0], [0], [1], [0, 0, 1, 1], [], []>} : vector<16x16xbf16>, vector<16x128xbf16>, vector<16x128xf32> -> vector<16x128xf32>
    %129 = tpu.reciprocal %126 {approx = true} : vector<16x1xf32> -> vector<16x1xf32>
    %130 = vector.broadcast %129 : vector<16x1xf32> to vector<16x128xf32>
    %131 = arith.mulf %128, %130 : vector<16x128xf32>
    %132 = tpu.concatenate %113, %131 in 1 : vector<16x128xf32>, vector<16x128xf32> -> vector<16x256xf32>
    %133 = tpu.concatenate %85, %132 in 0 : vector<16x256xf32>, vector<16x256xf32> -> vector<32x256xf32>
    %c0_i32_46 = arith.constant 0 : i32
    %134 = arith.cmpi eq, %arg1, %c0_i32_46 : i32
    %135 = arith.extui %134 : i1 to i32
    %c0_i32_47 = arith.constant 0 : i32
    %136 = arith.cmpi ne, %135, %c0_i32_47 : i32
    scf.if %136 {
      %cst_55 = arith.constant 0.000000e+00 : f32
      %145 = vector.broadcast %cst_55 : f32 to vector<32x256xf32>
      %c0_56 = arith.constant 0 : index
      %c0_57 = arith.constant 0 : index
      %146 = vector.load %arg15[%c0_56, %c0_57] : memref<32x256xf32, #tpu.memory_space<vmem>>, vector<32x256xf32>
      tpu.vector_store %arg15[%c0_56, %c0_57], %145 {strides = array<i32>} : memref<32x256xf32, #tpu.memory_space<vmem>>, vector<32x256xf32>,
    } else {
    }
    %c0_48 = arith.constant 0 : index
    %c0_49 = arith.constant 0 : index
    %137 = vector.load %arg15[%c0_48, %c0_49] : memref<32x256xf32, #tpu.memory_space<vmem>>, vector<32x256xf32>
    %138 = arith.truncf %133 : vector<32x256xf32> to vector<32x256xbf16>
    %cst_50 = arith.constant dense<0.000000e+00> : vector<32x256xf32>
    %139 = tpu.matmul %138, %11, %cst_50 {dimension_numbers = #tpu.dot_dimension_numbers<[1], [0], [0], [1], [0, 0, 1, 1], [], []>} : vector<32x256xbf16>, vector<256x256xbf16>, vector<32x256xf32> -> vector<32x256xf32>
    %140 = arith.addf %137, %139 : vector<32x256xf32>
    %c0_51 = arith.constant 0 : index
    %c0_52 = arith.constant 0 : index
    %141 = vector.load %arg15[%c0_51, %c0_52] : memref<32x256xf32, #tpu.memory_space<vmem>>, vector<32x256xf32>
    tpu.vector_store %arg15[%c0_51, %c0_52], %140 {strides = array<i32>} : memref<32x256xf32, #tpu.memory_space<vmem>>, vector<32x256xf32>,
    %c0_i32_53 = arith.constant 0 : i32
    %142 = arith.cmpi eq, %arg1, %c0_i32_53 : i32
    %143 = arith.extui %142 : i1 to i32
    %c0_i32_54 = arith.constant 0 : i32
    %144 = arith.cmpi ne, %143, %c0_i32_54 : i32
    scf.if %144 {
      %c0_55 = arith.constant 0 : index
      %c0_56 = arith.constant 0 : index
      %145 = vector.load %arg15[%c0_55, %c0_56] : memref<32x256xf32, #tpu.memory_space<vmem>>, vector<32x256xf32>
      %c0_57 = arith.constant 0 : index
      %c0_58 = arith.constant 0 : index
      %146 = vector.load %arg13[%c0_57, %c0_58] : memref<1x256xf32, #tpu.memory_space<vmem>>, vector<1x256xf32>
      %147 = vector.broadcast %146 : vector<1x256xf32> to vector<32x256xf32>
      %148 = arith.addf %145, %147 : vector<32x256xf32>
      %149 = vector.shape_cast %148 : vector<32x256xf32> to vector<2x16x256xf32>
      %c0_59 = arith.constant 0 : index
      %c0_60 = arith.constant 0 : index
      %c0_61 = arith.constant 0 : index
      %150 = vector.load %arg14[%c0_59, %c0_60, %c0_61] : memref<2x16x256xf32, #tpu.memory_space<vmem>>, vector<2x16x256xf32>
      tpu.vector_store %arg14[%c0_59, %c0_60, %c0_61], %149 {strides = array<i32>} : memref<2x16x256xf32, #tpu.memory_space<vmem>>, vector<2x16x256xf32>,
    } else {
    }
    return
  }
  func.func @transform_0(%arg0: i32, %arg1: i32, %arg2: memref<2xi32, #tpu.memory_space<smem>>) -> (i32, i32, i32) {
    %c0_i32 = arith.constant 0 : i32
    %c0_i32_0 = arith.constant 0 : i32
    %c0_i32_1 = arith.constant 0 : i32
    return %arg0, %c0_i32, %c0_i32_0 : i32, i32, i32
  }
  func.func @transform_1(%arg0: i32, %arg1: i32, %arg2: memref<2xi32, #tpu.memory_space<smem>>) -> (i32, i32, i32) {
    %c0_i32 = arith.constant 0 : i32
    %c0_i32_0 = arith.constant 0 : i32
    %c0_i32_1 = arith.constant 0 : i32
    return %arg0, %c0_i32, %c0_i32_0 : i32, i32, i32
  }
  func.func @transform_2(%arg0: i32, %arg1: i32, %arg2: memref<2xi32, #tpu.memory_space<smem>>) -> (i32, i32, i32) {
    %c0_i32 = arith.constant 0 : i32
    %c0_i32_0 = arith.constant 0 : i32
    %c0_i32_1 = arith.constant 0 : i32
    return %arg0, %c0_i32, %c0_i32_0 : i32, i32, i32
  }
  func.func @transform_3(%arg0: i32, %arg1: i32, %arg2: memref<2xi32, #tpu.memory_space<smem>>) -> (i32, i32, i32) {
    %c0_i32 = arith.constant 0 : i32
    %c0_i32_0 = arith.constant 0 : i32
    %c0_i32_1 = arith.constant 0 : i32
    %c0_i32_2 = arith.constant 0 : i32
    return %c0_i32, %c0_i32_0, %c0_i32_1 : i32, i32, i32
  }
  func.func @transform_4(%arg0: i32, %arg1: i32, %arg2: memref<2xi32, #tpu.memory_space<smem>>) -> (i32, i32, i32) {
    %c0_i32 = arith.constant 0 : i32
    %c0_i32_0 = arith.constant 0 : i32
    %c0_i32_1 = arith.constant 0 : i32
    %c0_i32_2 = arith.constant 0 : i32
    return %c0_i32, %c0_i32_0, %c0_i32_1 : i32, i32, i32
  }
  func.func @transform_5(%arg0: i32, %arg1: i32, %arg2: memref<2xi32, #tpu.memory_space<smem>>) -> (i32, i32, i32) {
    %c0_i32 = arith.constant 0 : i32
    %c0_i32_0 = arith.constant 0 : i32
    %c0_i32_1 = arith.constant 0 : i32
    %c0_i32_2 = arith.constant 0 : i32
    return %c0_i32, %c0_i32_0, %c0_i32_1 : i32, i32, i32
  }
  func.func @transform_6(%arg0: i32, %arg1: i32, %arg2: memref<2xi32, #tpu.memory_space<smem>>) -> (i32, i32, i32) {
    %c0_i32 = arith.constant 0 : i32
    %c0_i32_0 = arith.constant 0 : i32
    %c0_i32_1 = arith.constant 0 : i32
    %c0_i32_2 = arith.constant 0 : i32
    return %c0_i32, %c0_i32_0, %c0_i32_1 : i32, i32, i32
  }
  func.func @transform_7(%arg0: i32, %arg1: i32, %arg2: memref<2xi32, #tpu.memory_space<smem>>) -> (i32, i32, i32) {
    %c0_i32 = arith.constant 0 : i32
    %c0_i32_0 = arith.constant 0 : i32
    %c0_i32_1 = arith.constant 0 : i32
    %c0_i32_2 = arith.constant 0 : i32
    return %c0_i32, %c0_i32_0, %c0_i32_1 : i32, i32, i32
  }
  func.func @transform_8(%arg0: i32, %arg1: i32, %arg2: memref<2xi32, #tpu.memory_space<smem>>) -> (i32, i32, i32) {
    %c0_i32 = arith.constant 0 : i32
    %c0_i32_0 = arith.constant 0 : i32
    %c0_i32_1 = arith.constant 0 : i32
    %c0_i32_2 = arith.constant 0 : i32
    return %c0_i32, %c0_i32_0, %c0_i32_1 : i32, i32, i32
  }
  func.func @transform_9(%arg0: i32, %arg1: i32, %arg2: memref<2xi32, #tpu.memory_space<smem>>) -> (i32, i32, i32) {
    %c0_i32 = arith.constant 0 : i32
    %c0_i32_0 = arith.constant 0 : i32
    %c0_i32_1 = arith.constant 0 : i32
    %c0_i32_2 = arith.constant 0 : i32
    return %c0_i32, %c0_i32_0, %c0_i32_1 : i32, i32, i32
  }
  func.func @transform_10(%arg0: i32, %arg1: i32, %arg2: memref<2xi32, #tpu.memory_space<smem>>) -> (i32, i32) {
    %c0_i32 = arith.constant 0 : i32
    %c0_i32_0 = arith.constant 0 : i32
    %c0_i32_1 = arith.constant 0 : i32
    return %c0_i32, %c0_i32_0 : i32, i32
  }
  func.func @transform_11(%arg0: i32, %arg1: i32, %arg2: memref<2xi32, #tpu.memory_space<smem>>) -> (i32, i32, i32) {
    %c0_i32 = arith.constant 0 : i32
    %c0_i32_0 = arith.constant 0 : i32
    %c0_i32_1 = arith.constant 0 : i32
    return %arg0, %c0_i32, %c0_i32_0 : i32, i32, i32
  }
}

</mosaic_0001>

<bundles_post_ra>
// kernel: tpu_custom_call.1
= control target key start
LH: loop header
LB: loop body
LE: loop exit
PB: predicated region body
PF: predicated region fallthrough
CT: control target
= control target key end

     0   :  { %s2591_s21 = smov [#allocation4]   ;;  %s2866_s0 = inlined_call_operand.hbm [shape: s32[2], index: 0, kind: input, shape index: {}]   ;;  %s2867_s1 = inlined_call_operand.hbm [shape: bf16[2,16,256], index: 1, kind: input, shape index: {}]   ;;  %s2868_s2 = inlined_call_operand.hbm [shape: bf16[2,16,256], index: 2, kind: input, shape index: {}]   ;;  %s2869_s3 = inlined_call_operand.hbm [shape: bf16[2,16,256], index: 3, kind: input, shape index: {}]   ;;  %s2870_s4 = inlined_call_operand.hbm [shape: bf16[1,256,256], index: 4, kind: input, shape index: {}]   ;;  %s2871_s5 = inlined_call_operand.vmem [shape: f32[1,1,256], index: 5, kind: input, shape index: {}]   ;;  %s2872_s6 = inlined_call_operand.hbm [shape: bf16[1,256,256], index: 6, kind: input, shape index: {}]   ;;  %s2873_s7 = inlined_call_operand.vmem [shape: f32[1,1,256], index: 7, kind: input, shape index: {}]   ;;  %s2874_s8 = inlined_call_operand.hbm [shape: bf16[1,256,256], index: 8, kind: input, shape index: {}]   ;;  %s2875_s9 = inlined_call_operand.vmem [shape: f32[1,1,256], index: 9, kind: input, shape index: {}]   ;;  %s2876_s10 = inlined_call_operand.hbm [shape: bf16[1,256,256], index: 10, kind: input, shape index: {}]   ;;  %s2877_s11 = inlined_call_operand.vmem [shape: f32[1,256], index: 11, kind: input, shape index: {}]   ;;  %s2878_s12 = inlined_call_operand.hbm [shape: f32[2,16,256], index: 12, kind: output, shape index: {}]  }
   0x1   :  { %18 = dma.hbm_to_smem %s2866_s0, 16, %s2591_s21, [#allocation3] }
   0x2   :  { %2579 = dma.done.wait [#allocation3], 16 }
   0x3   :  { %2580 = vsyncadd [#allocation3], 4294967280 }
   0x4   :  { %20 = sfence }
   0x5   :  { %21 = vsyncpa [#allocation6], 0 }
   0x6   :  { %22 = vsyncpa [#allocation9], 0 }
   0x7   :  { %23 = vsyncpa [#allocation12], 0 }
   0x8   :  { %24 = vsyncpa [#allocation15], 0 }
   0x9   :  { %25 = vsyncpa [#allocation7], 0  ;;  %s2592_s24 = smov [#allocation8]   ;;  %s2593_s26 = smov [#allocation11]  }
   0xa   :  { %s43_s25 = sshll.u32 %s2592_s24, 4  ;;  %s67_s27 = sshll.u32 %s2593_s26, 4  ;;  %s44_s25 = int_to_ptr.vmem [resolvable:$true] %s43_s25  ;;  %s68_s27 = int_to_ptr.vmem [resolvable:$true] %s67_s27 }
   0xb   :  { %s2427_s28 = scalar_lea.vmem %s44_s25, 512  ;;  %p2432_p1 = scmp.lt.s32.totalorder %s44_s25, %s44_s25 }
   0xc   :  { %p2428_p0 = scmp.ne.s32.totalorder %s44_s25, %s2427_s28  ;;  %p2433_p2 = scmp.lt.s32.totalorder %s2427_s28, %s2427_s28 }
   0xe   :  { %p2434_p3 = por %p2433_p2, %p2432_p1 }
  0x10   :  { %p2435_p4 = pnand %p2434_p3, %p2428_p0 }
  0x12   :  { %2438 = shalt.err (!%p2435_p4)
}
  0x13   :  { %s2594_s0 = smov 128   ;;  %s2595_s29 = smov 8  }
  0x14   :  { %49 = dma.hbm_to_vmem [thread:$0]  %s2868_s2, 512, %s44_s25, [#allocation9], %s2594_s0, %s2594_s0, %s2595_s29  }
  0x15   :  { %s2447_s14 = scalar_lea.vmem %s68_s27, 4096  ;;  %p2452_p6 = scmp.lt.s32.totalorder %s68_s27, %s68_s27 }
  0x16   :  { %p2448_p5 = scmp.ne.s32.totalorder %s68_s27, %s2447_s14  ;;  %p2453_p7 = scmp.lt.s32.totalorder %s2447_s14, %s2447_s14 }
  0x18   :  { %p2454_p8 = por %p2453_p7, %p2452_p6 }
  0x1a   :  { %p2455_p9 = pnand %p2454_p8, %p2448_p5 }
  0x1c   :  { %2458 = shalt.err (!%p2455_p9)
}
  0x1d   :  { %73 = dma.hbm_to_vmem [thread:$0]  %s2870_s4, 4096, %s68_s27, [#allocation12], %s2594_s0, %s2594_s0, %s2595_s29  }
  0x1e   :  { %s2596_s17 = smov [#allocation14]   ;;  %s2597_s19 = smov [#allocation5]  }
  0x1f   :  { %s95_s18 = sshll.u32 %s2596_s17, 4  ;;  %s31_s20 = sshll.u32 %s2597_s19, 4  ;;  %s96_s18 = int_to_ptr.vmem [resolvable:$true] %s95_s18  ;;  %s32_s20 = int_to_ptr.vmem [resolvable:$true] %s31_s20 }
  0x20   :  { %s2467_s2 = scalar_lea.vmem %s96_s18, 4096  ;;  %p2472_p11 = scmp.lt.s32.totalorder %s96_s18, %s96_s18 }
  0x21   :  { %p2468_p10 = scmp.ne.s32.totalorder %s96_s18, %s2467_s2  ;;  %p2473_p12 = scmp.lt.s32.totalorder %s2467_s2, %s2467_s2 }
  0x23   :  { %p2474_p13 = por %p2473_p12, %p2472_p11 }
  0x25   :  { %p2475_p0 = pnand %p2474_p13, %p2468_p10 }
  0x27   :  { %2478 = shalt.err (!%p2475_p0)
}
  0x28   :  { %101 = dma.hbm_to_vmem [thread:$0]  %s2874_s8, 4096, %s96_s18, [#allocation15], %s2594_s0, %s2594_s0, %s2595_s29  }
  0x29   :  { %s2487_s4 = scalar_lea.vmem %s32_s20, 512  ;;  %p2492_p2 = scmp.lt.s32.totalorder %s32_s20, %s32_s20 }
  0x2a   :  { %p2488_p1 = scmp.ne.s32.totalorder %s32_s20, %s2487_s4  ;;  %p2493_p3 = scmp.lt.s32.totalorder %s2487_s4, %s2487_s4 }
  0x2c   :  { %p2494_p4 = por %p2493_p3, %p2492_p2 }
  0x2e   :  { %p2495_p5 = pnand %p2494_p4, %p2488_p1 }
  0x30   :  { %2498 = shalt.err (!%p2495_p5)
}
  0x31   :  { %37 = dma.hbm_to_vmem [thread:$0]  %s2867_s1, 512, %s32_s20, [#allocation6], %s2594_s0, %s2594_s0, %s2595_s29  }
  0x32   :  { %s2598_s25 = smov [#allocation10]   ;;  %s2599_s27 = smov [#allocation13]  }
  0x33   :  { %s55_s26 = sshll.u32 %s2598_s25, 4  ;;  %s81_s28 = sshll.u32 %s2599_s27, 4  ;;  %s56_s26 = int_to_ptr.vmem [resolvable:$true] %s55_s26  ;;  %s82_s28 = int_to_ptr.vmem [resolvable:$true] %s81_s28 }
  0x34   :  { %s2507_s8 = scalar_lea.vmem %s56_s26, 512  ;;  %p2512_p7 = scmp.lt.s32.totalorder %s56_s26, %s56_s26 }
  0x35   :  { %p2508_p6 = scmp.ne.s32.totalorder %s56_s26, %s2507_s8  ;;  %p2513_p8 = scmp.lt.s32.totalorder %s2507_s8, %s2507_s8 }
  0x37   :  { %p2514_p9 = por %p2513_p8, %p2512_p7 }
  0x39   :  { %p2515_p10 = pnand %p2514_p9, %p2508_p6 }
  0x3b   :  { %2518 = shalt.err (!%p2515_p10)
}
  0x3c   :  { %61 = dma.hbm_to_vmem [thread:$0]  %s2869_s3, 512, %s56_s26, [#allocation9], %s2594_s0, %s2594_s0, %s2595_s29  }
  0x3d   :  { %s2527_s1 = scalar_lea.vmem %s82_s28, 4096  ;;  %p2532_p12 = scmp.lt.s32.totalorder %s82_s28, %s82_s28 }
  0x3e   :  { %p2528_p11 = scmp.ne.s32.totalorder %s82_s28, %s2527_s1  ;;  %p2533_p13 = scmp.lt.s32.totalorder %s2527_s1, %s2527_s1 }
  0x40   :  { %p2534_p0 = por %p2533_p13, %p2532_p12 }
  0x42   :  { %p2535_p1 = pnand %p2534_p0, %p2528_p11 }
  0x44   :  { %2538 = shalt.err (!%p2535_p1)
}
  0x45   :  { %87 = dma.hbm_to_vmem [thread:$0]  %s2872_s6, 4096, %s82_s28, [#allocation12], %s2594_s0, %s2594_s0, %s2595_s29  }
  0x46   :  { %s2600_s16 = smov [#allocation16]  }
  0x47   :  { %s109_s17 = sshll.u32 %s2600_s16, 4  ;;  %s110_s17 = int_to_ptr.vmem [resolvable:$true] %s109_s17 }
  0x48   :  { %s2547_s18 = scalar_lea.vmem %s110_s17, 4096  ;;  %p2552_p3 = scmp.lt.s32.totalorder %s110_s17, %s110_s17 }
  0x49   :  { %p2548_p2 = scmp.ne.s32.totalorder %s110_s17, %s2547_s18  ;;  %p2553_p4 = scmp.lt.s32.totalorder %s2547_s18, %s2547_s18 }
  0x4b   :  { %p2554_p5 = por %p2553_p4, %p2552_p3 }
  0x4d   :  { %p2555_p6 = pnand %p2554_p5, %p2548_p2 }
  0x4f   :  { %2558 = shalt.err (!%p2555_p6)
}
  0x50   :  { %115 = dma.hbm_to_vmem [thread:$0]  %s2876_s10, 4096, %s110_s17, [#allocation15], %s2594_s0, %s2594_s0, %s2595_s29  }
  0x51   :  { %2581 = dma.done.wait [#allocation6], 512  }
  0x52   :  { %2582 = vsyncadd [#allocation6], 4294966784 }
  0x53   :  { %2583 = dma.done.wait [#allocation9], 1024  }
  0x54   :  { %2584 = vsyncadd [#allocation9], 4294966272 }
  0x55   :  { %2585 = dma.done.wait [#allocation12], 8192  }
  0x56   :  { %2586 = vsyncadd [#allocation12], 4294959104 }
  0x57   :  { %2587 = dma.done.wait [#allocation15], 8192  }
  0x58   :  { %2588 = vsyncadd [#allocation15], 4294959104  ;;  %v2169_v0 = vld [vmem:[#allocation11 + $0x74] ss:$8 sps:$4 sm:$0xff]   ;;  %v2173_v2 = vld [vmem:[#allocation11 + $0x70] ss:$8 sps:$4 sm:$0xff]  }
  0x59   :  { %v2171_v1 = vld [vmem:[#allocation13 + $0x74] ss:$8 sps:$4 sm:$0xff]   ;;  %487 = vmatprep.subr.bf16.mxu0 %v2169_v0  ;;  %v2174_v3 = vld [vmem:[#allocation13 + $0x70] ss:$8 sps:$4 sm:$0xff]   ;;  %v2175_v4 = vld [vmem:[#allocation11 + $0x64] ss:$8 sps:$4 sm:$0xff]  }
  0x5a   :  { %739 = vmatprep.subr.bf16.mxu1 %v2171_v1  ;;  %488 = vmatpush1.bf16.msra.mxu0 %v2173_v2  ;;  %v2177_v5 = vld [vmem:[#allocation13 + $0x64] ss:$8 sps:$4 sm:$0xff]   ;;  %v2179_v6 = vld [vmem:[#allocation11 + $0x60] ss:$8 sps:$4 sm:$0xff]   ;;  %v2181_v8 = vld [vmem:[#allocation11 + $0x54] ss:$8 sps:$4 sm:$0xff]  }
  0x5b   :  { %740 = vmatpush1.bf16.msra.mxu1 %v2174_v3  ;;  %489 = vmatprep.subr.bf16.mxu0 %v2175_v4  ;;  %v2180_v7 = vld [vmem:[#allocation13 + $0x60] ss:$8 sps:$4 sm:$0xff]   ;;  %v2183_v9 = vld [vmem:[#allocation13 + $0x54] ss:$8 sps:$4 sm:$0xff]   ;;  %v2185_v10 = vld [vmem:[#allocation11 + $0x50] ss:$8 sps:$4 sm:$0xff]  }
  0x5c   :  { %741 = vmatprep.subr.bf16.mxu1 %v2177_v5  ;;  %v2186_v11 = vld [vmem:[#allocation13 + $0x50] ss:$8 sps:$4 sm:$0xff]   ;;  %v2187_v12 = vld [vmem:[#allocation11 + $0x44] ss:$8 sps:$4 sm:$0xff]   ;;  %v2191_v14 = vld [vmem:[#allocation11 + $0x40] ss:$8 sps:$4 sm:$0xff]  }
  0x5d   :  { %v2189_v13 = vld [vmem:[#allocation13 + $0x44] ss:$8 sps:$4 sm:$0xff]   ;;  %v2192_v15 = vld [vmem:[#allocation13 + $0x40] ss:$8 sps:$4 sm:$0xff]   ;;  %v2193_v16 = vld [vmem:[#allocation11 + $0x34] ss:$8 sps:$4 sm:$0xff]  }
  0x5e   :  { %490 = vmatpush1.bf16.msra.mxu0 %v2179_v6  ;;  %v2195_v17 = vld [vmem:[#allocation13 + $0x34] ss:$8 sps:$4 sm:$0xff]   ;;  %v2197_v18 = vld [vmem:[#allocation11 + $0x30] ss:$8 sps:$4 sm:$0xff]   ;;  %v2199_v20 = vld [vmem:[#allocation11 + $0x24] ss:$8 sps:$4 sm:$0xff]  }
  0x5f   :  { %742 = vmatpush1.bf16.msra.mxu1 %v2180_v7  ;;  %491 = vmatprep.subr.bf16.mxu0 %v2181_v8  ;;  %v2198_v19 = vld [vmem:[#allocation13 + $0x30] ss:$8 sps:$4 sm:$0xff]   ;;  %v2201_v21 = vld [vmem:[#allocation13 + $0x24] ss:$8 sps:$4 sm:$0xff]   ;;  %v2203_v22 = vld [vmem:[#allocation11 + $0x20] ss:$8 sps:$4 sm:$0xff]  }
  0x60   :  { %743 = vmatprep.subr.bf16.mxu1 %v2183_v9  ;;  %v2204_v23 = vld [vmem:[#allocation13 + $0x20] ss:$8 sps:$4 sm:$0xff]   ;;  %v2205_v24 = vld [vmem:[#allocation11 + $0x14] ss:$8 sps:$4 sm:$0xff]   ;;  %v2209_v26 = vld [vmem:[#allocation11 + $0x10] ss:$8 sps:$4 sm:$0xff]  }
  0x61   :  { %v2207_v25 = vld [vmem:[#allocation13 + $0x14] ss:$8 sps:$4 sm:$0xff]   ;;  %v2210_v27 = vld [vmem:[#allocation13 + $0x10] ss:$8 sps:$4 sm:$0xff]   ;;  %v2211_v28 = vld [vmem:[#allocation11 + $0x4] ss:$8 sps:$4 sm:$0xff]  }
  0x62   :  { %492 = vmatpush1.bf16.msra.mxu0 %v2185_v10  ;;  %v2213_v29 = vld [vmem:[#allocation13 + $0x4] ss:$8 sps:$4 sm:$0xff]   ;;  %v2215_v30 = vld [vmem:[#allocation11] ss:$8 sps:$4 sm:$0xff]   ;;  %v2217_v32 = vld [vmem:[#allocation11 + $0xf4] ss:$8 sps:$4 sm:$0xff]  }
  0x63   :  { %744 = vmatpush1.bf16.msra.mxu1 %v2186_v11  ;;  %493 = vmatprep.subr.bf16.mxu0 %v2187_v12  ;;  %v2216_v31 = vld [vmem:[#allocation13] ss:$8 sps:$4 sm:$0xff]   ;;  %v2219_v33 = vld [vmem:[#allocation13 + $0xf4] ss:$8 sps:$4 sm:$0xff]   ;;  %v2221_v34 = vld [vmem:[#allocation11 + $0xf0] ss:$8 sps:$4 sm:$0xff]  }
  0x64   :  { %745 = vmatprep.subr.bf16.mxu1 %v2189_v13  ;;  %v2222_v35 = vld [vmem:[#allocation13 + $0xf0] ss:$8 sps:$4 sm:$0xff]   ;;  %v2223_v36 = vld [vmem:[#allocation11 + $0xe4] ss:$8 sps:$4 sm:$0xff]   ;;  %v2227_v38 = vld [vmem:[#allocation11 + $0xe0] ss:$8 sps:$4 sm:$0xff]  }
  0x65   :  { %v2225_v37 = vld [vmem:[#allocation13 + $0xe4] ss:$8 sps:$4 sm:$0xff]   ;;  %v2228_v39 = vld [vmem:[#allocation13 + $0xe0] ss:$8 sps:$4 sm:$0xff]   ;;  %v2229_v40 = vld [vmem:[#allocation11 + $0xd4] ss:$8 sps:$4 sm:$0xff]  }
  0x66   :  { %494 = vmatpush1.bf16.msra.mxu0 %v2191_v14  ;;  %v2231_v41 = vld [vmem:[#allocation13 + $0xd4] ss:$8 sps:$4 sm:$0xff]   ;;  %v2233_v42 = vld [vmem:[#allocation11 + $0xd0] ss:$8 sps:$4 sm:$0xff]   ;;  %v2235_v44 = vld [vmem:[#allocation11 + $0xc4] ss:$8 sps:$4 sm:$0xff]  }
  0x67   :  { %746 = vmatpush1.bf16.msra.mxu1 %v2192_v15  ;;  %495 = vmatprep.subr.bf16.mxu0 %v2193_v16  ;;  %v2234_v43 = vld [vmem:[#allocation13 + $0xd0] ss:$8 sps:$4 sm:$0xff]   ;;  %v2237_v45 = vld [vmem:[#allocation13 + $0xc4] ss:$8 sps:$4 sm:$0xff]   ;;  %v2239_v46 = vld [vmem:[#allocation11 + $0xc0] ss:$8 sps:$4 sm:$0xff]  }
  0x68   :  { %747 = vmatprep.subr.bf16.mxu1 %v2195_v17  ;;  %v2240_v47 = vld [vmem:[#allocation13 + $0xc0] ss:$8 sps:$4 sm:$0xff]   ;;  %v2241_v48 = vld [vmem:[#allocation11 + $0xb4] ss:$8 sps:$4 sm:$0xff]   ;;  %v2267_v49 = vld [vmem:[#allocation8 + $0x4] ss:$8 sps:$4 sm:$0xff]  }
  0x69   :  { %v2243_v50 = vld [vmem:[#allocation13 + $0xb4] ss:$8 sps:$4 sm:$0xff]   ;;  %v2270_v51 = vld [vmem:[#allocation5 + $0x4] ss:$8 sps:$4 sm:$0xff]   ;;  %771 = vmatprep.mubr.bf16.mxu1 %v2267_v49  ;;  %v2245_v52 = vld [vmem:[#allocation11 + $0xb0] ss:$8 sps:$4 sm:$0xff]  }
  0x6a   :  { %496 = vmatpush1.bf16.msra.mxu0 %v2197_v18  ;;  %v2246_v53 = vld [vmem:[#allocation13 + $0xb0] ss:$8 sps:$4 sm:$0xff]   ;;  %519 = vmatprep.mubr.bf16.mxu0 %v2270_v51  ;;  %v2247_v54 = vld [vmem:[#allocation11 + $0xa4] ss:$8 sps:$4 sm:$0xff]   ;;  %v2251_v56 = vld [vmem:[#allocation11 + $0xa0] ss:$8 sps:$4 sm:$0xff]  }
  0x6b   :  { %748 = vmatpush1.bf16.msra.mxu1 %v2198_v19  ;;  %497 = vmatprep.subr.bf16.mxu0 %v2199_v20  ;;  %v2249_v55 = vld [vmem:[#allocation13 + $0xa4] ss:$8 sps:$4 sm:$0xff]   ;;  %v2252_v57 = vld [vmem:[#allocation13 + $0xa0] ss:$8 sps:$4 sm:$0xff]   ;;  %v2253_v58 = vld [vmem:[#allocation11 + $0x94] ss:$8 sps:$4 sm:$0xff]  }
  0x6c   :  { %749 = vmatprep.subr.bf16.mxu1 %v2201_v21  ;;  %v2255_v59 = vld [vmem:[#allocation13 + $0x94] ss:$8 sps:$4 sm:$0xff]   ;;  %v2257_v60 = vld [vmem:[#allocation11 + $0x90] ss:$8 sps:$4 sm:$0xff]   ;;  %v2259_v62 = vld [vmem:[#allocation11 + $0x84] ss:$8 sps:$4 sm:$0xff]  }
  0x6d   :  { %v2258_v61 = vld [vmem:[#allocation13 + $0x90] ss:$8 sps:$4 sm:$0xff]   ;;  %v2261_v63 = vld [vmem:[#allocation13 + $0x84] ss:$8 sps:$4 sm:$0xff]   ;;  %v2263_v0 = vld [vmem:[#allocation11 + $0x80] ss:$8 sps:$4 sm:$0xff]  }
  0x6e   :  { %498 = vmatpush1.bf16.msra.mxu0 %v2203_v22  ;;  %v2264_v1 = vld [vmem:[#allocation13 + $0x80] ss:$8 sps:$4 sm:$0xff]   ;;  %v2273_v2 = vld [vmem:[#allocation14 + $0x74] ss:$8 sps:$4 sm:$0xff]   ;;  %v2271_v5 = vld [vmem:[#allocation14 + $0x70] ss:$8 sps:$4 sm:$0xff]  }
  0x6f   :  { %750 = vmatpush1.bf16.msra.mxu1 %v2204_v23  ;;  %499 = vmatprep.subr.bf16.mxu0 %v2205_v24  ;;  %v2265_v3 = vld [vmem:[#allocation8] ss:$8 sps:$4 sm:$0xff]   ;;  %v2313_v6 = vld [vmem:[#allocation5 + $0x14] ss:$8 sps:$4 sm:$0xff]   ;;  %v2276_v7 = vld [vmem:[#allocation14 + $0x64] ss:$8 sps:$4 sm:$0xff]  }
  0x70   :  { %751 = vmatprep.subr.bf16.mxu1 %v2207_v25  ;;  %v2268_v4 = vld [vmem:[#allocation5] ss:$8 sps:$4 sm:$0xff]   ;;  %v2279_v9 = vld [vmem:[#allocation14 + $0x54] ss:$8 sps:$4 sm:$0xff]   ;;  %v2315_v10 = vld [vmem:[#allocation5 + $0x10] ss:$8 sps:$4 sm:$0xff]  }
  0x71   :  { %v2274_v8 = vld [vmem:[#allocation14 + $0x60] ss:$8 sps:$4 sm:$0xff]   ;;  %v2277_v11 = vld [vmem:[#allocation14 + $0x50] ss:$8 sps:$4 sm:$0xff]   ;;  %v2324_v12 = vld [vmem:[#allocation10 + $0x4] ss:$8 sps:$4 sm:$0xff]  }
  0x72   :  { %500 = vmatpush1.bf16.msra.mxu0 %v2209_v26  ;;  %v2282_v13 = vld [vmem:[#allocation14 + $0x44] ss:$8 sps:$4 sm:$0xff]   ;;  %v2280_v14 = vld [vmem:[#allocation14 + $0x40] ss:$8 sps:$4 sm:$0xff]   ;;  %v2285_v15 = vld [vmem:[#allocation14 + $0x34] ss:$8 sps:$4 sm:$0xff]  }
  0x73   :  { %752 = vmatpush1.bf16.msra.mxu1 %v2210_v27  ;;  %501 = vmatprep.subr.bf16.mxu0 %v2211_v28  ;;  %v2283_v16 = vld [vmem:[#allocation14 + $0x30] ss:$8 sps:$4 sm:$0xff]   ;;  %v2288_v17 = vld [vmem:[#allocation14 + $0x24] ss:$8 sps:$4 sm:$0xff]   ;;  %v2286_v18 = vld [vmem:[#allocation14 + $0x20] ss:$8 sps:$4 sm:$0xff]  }
  0x74   :  { %753 = vmatprep.subr.bf16.mxu1 %v2213_v29  ;;  %v2291_v19 = vld [vmem:[#allocation14 + $0x14] ss:$8 sps:$4 sm:$0xff]   ;;  %v2289_v20 = vld [vmem:[#allocation14 + $0x10] ss:$8 sps:$4 sm:$0xff]   ;;  %v2294_v21 = vld [vmem:[#allocation14 + $0x4] ss:$8 sps:$4 sm:$0xff]  }
  0x75   :  { %v2292_v22 = vld [vmem:[#allocation14] ss:$8 sps:$4 sm:$0xff]   ;;  %v2297_v23 = vld [vmem:[#allocation14 + $0xf4] ss:$8 sps:$4 sm:$0xff]   ;;  %v2295_v24 = vld [vmem:[#allocation14 + $0xf0] ss:$8 sps:$4 sm:$0xff]  }
  0x76   :  { %502 = vmatpush1.bf16.msra.mxu0 %v2215_v30  ;;  %v2300_v25 = vld [vmem:[#allocation14 + $0xe4] ss:$8 sps:$4 sm:$0xff]   ;;  %v2298_v26 = vld [vmem:[#allocation14 + $0xe0] ss:$8 sps:$4 sm:$0xff]   ;;  %v2303_v27 = vld [vmem:[#allocation14 + $0xd4] ss:$8 sps:$4 sm:$0xff]  }
  0x77   :  { %754 = vmatpush1.bf16.msra.mxu1 %v2216_v31  ;;  %503 = vmatprep.subr.bf16.mxu0 %v2217_v32  ;;  %v2301_v28 = vld [vmem:[#allocation14 + $0xd0] ss:$8 sps:$4 sm:$0xff]   ;;  %v2306_v29 = vld [vmem:[#allocation14 + $0xc4] ss:$8 sps:$4 sm:$0xff]   ;;  %v2304_v30 = vld [vmem:[#allocation14 + $0xc0] ss:$8 sps:$4 sm:$0xff]  }
  0x78   :  { %755 = vmatprep.subr.bf16.mxu1 %v2219_v33  ;;  %v2309_v31 = vld [vmem:[#allocation14 + $0xb4] ss:$8 sps:$4 sm:$0xff]   ;;  %v2307_v32 = vld [vmem:[#allocation14 + $0xb0] ss:$8 sps:$4 sm:$0xff]   ;;  %v2312_v33 = vld [vmem:[#allocation14 + $0xa4] ss:$8 sps:$4 sm:$0xff]  }
  0x79   :  { %vm1122_vm1 = vcmask 130048   ;;  %vm2602_vm2 = vmmov 0   ;;  %s2043_s20 = sld [smem:[#allocation4 + $0x1]] }
  0x7a   :  { %504 = vmatpush2.bf16.msra.mxu0 %v2221_v34  ;;  %v2310_v34 = vld [vmem:[#allocation14 + $0xa0] ss:$8 sps:$4 sm:$0xff]  }
  0x7b   :  { %756 = vmatpush2.bf16.msra.mxu1 %v2222_v35  ;;  %505 = vmatprep.subr.bf16.mxu0 %v2223_v36  ;;  %v2318_v35 = vld [vmem:[#allocation14 + $0x94] ss:$8 sps:$4 sm:$0xff]   ;;  %v2316_v36 = vld [vmem:[#allocation14 + $0x90] ss:$8 sps:$4 sm:$0xff]  }
  0x7c   :  { %757 = vmatprep.subr.bf16.mxu1 %v2225_v37  ;;  %v2321_v37 = vld [vmem:[#allocation14 + $0x84] ss:$8 sps:$4 sm:$0xff]  }
  0x7e   :  { %506 = vmatpush2.bf16.msra.mxu0 %v2227_v38  ;;  %v2319_v38 = vld [vmem:[#allocation14 + $0x80] ss:$8 sps:$4 sm:$0xff]  }
  0x7f   :  { %758 = vmatpush2.bf16.msra.mxu1 %v2228_v39  ;;  %507 = vmatprep.subr.bf16.mxu0 %v2229_v40  ;;  %v2322_v39 = vld [vmem:[#allocation10] ss:$8 sps:$4 sm:$0xff]   ;;  %v2325_v40 = vld [vmem:[#allocation10 + $0x14] ss:$8 sps:$4 sm:$0xff]  }
  0x80   :  { %759 = vmatprep.subr.bf16.mxu1 %v2231_v41  ;;  %v2327_v41 = vld [vmem:[#allocation10 + $0x10] ss:$8 sps:$4 sm:$0xff]  }
  0x82   :  { %508 = vmatpush2.bf16.msra.mxu0 %v2233_v42  ;;  %v2601_v42 = vmov 0.0  }
  0x83   :  { %760 = vmatpush2.bf16.msra.mxu1 %v2234_v43  ;;  %509 = vmatprep.subr.bf16.mxu0 %v2235_v44  ;;  %v297_v43 = vlaneseq }
  0x84   :  { %761 = vmatprep.subr.bf16.mxu1 %v2237_v45  ;;  %v279_v45 = vld [vmem:[%s2871_s5] sm:$0x3] }
  0x85   :  { %v298_v44 = vshrl.u32 %v297_v43, 7 }
  0x86   :  { %510 = vmatpush2.bf16.msra.mxu0 %v2239_v46 }
  0x87   :  { %762 = vmatpush2.bf16.msra.mxu1 %v2240_v47  ;;  %511 = vmatprep.subr.bf16.mxu0 %v2241_v48  ;;  %v2721_v46 = vsub.s32 0, %v298_v44  ;;  %v2723_v47 = vsub.s32 1, %v298_v44 }
  0x88   :  { %763 = vmatprep.subr.bf16.mxu1 %v2243_v50  ;;  %v281_v50 = vld [vmem:[%s2873_s7] sm:$0x3] }
  0x89   :  { %v300_v48 = vrot.slane %v279_v45, %v2721_v46  ;;  %v304_v49 = vrot.slane %v279_v45, %v2723_v47 }
  0x8a   :  { %512 = vmatpush2.bf16.msra.mxu0 %v2245_v52 }
  0x8b   :  { %764 = vmatpush2.bf16.msra.mxu1 %v2246_v53  ;;  %513 = vmatprep.subr.bf16.mxu0 %v2247_v54 }
  0x8c   :  { %765 = vmatprep.subr.bf16.mxu1 %v2249_v55 }
  0x8e   :  { %514 = vmatpush2.bf16.msra.mxu0 %v2251_v56  ;;  %v2733_v56 = vrot.slane %v281_v50, %v2721_v46 }
  0x8f   :  { %766 = vmatpush2.bf16.msra.mxu1 %v2252_v57  ;;  %515 = vmatprep.subr.bf16.mxu0 %v2253_v58 }
  0x90   :  { %767 = vmatprep.subr.bf16.mxu1 %v2255_v59 }
  0x92   :  { %516 = vmatpush2.bf16.msra.mxu0 %v2257_v60 }
  0x93   :  { %768 = vmatpush2.bf16.msra.mxu1 %v2258_v61  ;;  %517 = vmatprep.subr.bf16.mxu0 %v2259_v62 }
  0x94   :  { %769 = vmatprep.subr.bf16.mxu1 %v2261_v63 }
  0x96   :  { %518 = vmatpush2.bf16.msra.mxu0 %v2263_v0 }
  0x97   :  { %770 = vmatpush2.bf16.msra.mxu1 %v2264_v1  ;;  %983 = vmatprep.subr.bf16.mxu0 %v2273_v2 }
  0x98   :  { %2135 = vmatprep.subr.bf16.mxu1 %v2601_v42 }
  0x99   :  { %520 = vmatmul.mubr.bf16.vlgmr.msra.gmra.mxu0 %v2268_v4 }
  0x9a   :  { %772 = vmatmul.mubr.bf16.vlgmr.msra.gmra.mxu1 %v2265_v3  ;;  %984 = vmatpush1.bf16.msra.mxu0 %v2271_v5 }
  0x9b   :  { %529 = vmatprep.mubr.bf16.mxu0 %v2313_v6  ;;  %985 = vmatprep.subr.bf16.mxu0 %v2276_v7 }
  0x9e   :  { %986 = vmatpush1.bf16.msra.mxu0 %v2274_v8 }
  0x9f   :  { %987 = vmatprep.subr.bf16.mxu0 %v2279_v9 }
  0xa1   :  { %530 = vmatmul.mubr.bf16.gmra.mxu0 %v2315_v10 }
  0xa2   :  { %988 = vmatpush1.bf16.msra.mxu0 %v2277_v11  ;;  %1015 = vmatprep.mubr.bf16.mxu0 %v2324_v12  ;;  %v283_v11 = vld [vmem:[%s2875_s9] sm:$0x3]  ;;  %s1041_s9 = sld [smem:[#allocation4]] }
  0xa3   :  { %989 = vmatprep.subr.bf16.mxu0 %v2282_v13  ;;  %v796_v12 = vrot.slane %v283_v11, %v2721_v46  ;;  %v800_v13 = vrot.slane %v283_v11, %v2723_v47 }
  0xa6   :  { %990 = vmatpush1.bf16.msra.mxu0 %v2280_v14 }
  0xa7   :  { %991 = vmatprep.subr.bf16.mxu0 %v2285_v15 }
  0xaa   :  { %992 = vmatpush1.bf16.msra.mxu0 %v2283_v16 }
  0xab   :  { %993 = vmatprep.subr.bf16.mxu0 %v2288_v17 }
  0xae   :  { %994 = vmatpush1.bf16.msra.mxu0 %v2286_v18 }
  0xaf   :  { %995 = vmatprep.subr.bf16.mxu0 %v2291_v19 }
  0xb2   :  { %996 = vmatpush1.bf16.msra.mxu0 %v2289_v20 }
  0xb3   :  { %997 = vmatprep.subr.bf16.mxu0 %v2294_v21  ;;  %v2758_v21 = vrot.slane %v281_v50, %v2723_v47  ;;  %v2330_v50 = vld [vmem:[#allocation8 + $0x10] ss:$8 sps:$4 sm:$0xff]  }
  0xb6   :  { %998 = vmatpush1.bf16.msra.mxu0 %v2292_v22 }
  0xb7   :  { %999 = vmatprep.subr.bf16.mxu0 %v2297_v23 }
  0xba   :  { %1000 = vmatpush2.bf16.msra.mxu0 %v2295_v24 }
  0xbb   :  { %1001 = vmatprep.subr.bf16.mxu0 %v2300_v25 }
  0xbe   :  { %1002 = vmatpush2.bf16.msra.mxu0 %v2298_v26 }
  0xbf   :  { %1003 = vmatprep.subr.bf16.mxu0 %v2303_v27 }
  0xc2   :  { %1004 = vmatpush2.bf16.msra.mxu0 %v2301_v28 }
  0xc3   :  { %1005 = vmatprep.subr.bf16.mxu0 %v2306_v29 }
  0xc6   :  { %1006 = vmatpush2.bf16.msra.mxu0 %v2304_v30 }
  0xc7   :  { %1007 = vmatprep.subr.bf16.mxu0 %v2309_v31 }
  0xca   :  { %1008 = vmatpush2.bf16.msra.mxu0 %v2307_v32 }
  0xcb   :  { %1009 = vmatprep.subr.bf16.mxu0 %v2312_v33 }
  0xce   :  { %1010 = vmatpush2.bf16.msra.mxu0 %v2310_v34 }
  0xcf   :  { %1011 = vmatprep.subr.bf16.mxu0 %v2318_v35 }
  0xd2   :  { %1012 = vmatpush2.bf16.msra.mxu0 %v2316_v36 }
  0xd3   :  { %1013 = vmatprep.subr.bf16.mxu0 %v2321_v37  ;;  %v2769_v37 = vand.u32 127, %v297_v43  ;;  %v2328_v43 = vld [vmem:[#allocation8 + $0x14] ss:$8 sps:$4 sm:$0xff]  }
  0xd4   :  { %781 = vmatprep.mubr.bf16.mxu1 %v2328_v43 }
  0xd5   :  { %782 = vmatmul.mubr.bf16.gmra.mxu1 %v2330_v50 }
  0xd6   :  { %1014 = vmatpush2.bf16.msra.mxu0 %v2319_v38  ;;  %v1044_v38 = vstv %s1041_s9  ;;  %2137 = vmatprep.mubr.msk.bf16.mxu1 %vm2602_vm2, %v2601_v42 }
  0xd7   :  { %vm1045_vm0 = vcmp.ge.s32.totalorder %v2769_v37, %v1044_v38  ;;  %v1334_v38 = vstv %s2043_s20 }
  0xd8   :  { %vm1335_vm3 = vcmp.ge.s32.totalorder %v2769_v37, %v1334_v38  ;;  %v2334_v38 = vld [vmem:[#allocation16 + $0x60] ss:$8 sps:$4 sm:$0xff]  }
  0xd9   :  { %1016 = vmatmul.mubr.bf16.vlgmr.msra.gmra.mxu0 %v2322_v39 }
  0xda   :  { %1025 = vmatprep.mubr.bf16.mxu0 %v2325_v40  ;;  %v1046_v40 = vsel %vm1045_vm0, -1e+09, %v2601_v42 }
  0xe1   :  { %1026 = vmatmul.mubr.bf16.gmra.mxu0 %v2327_v41 }
 0x159   :  { %v521_v52 = vpop.f32.mrf.mxu0 }
 0x15a   :  { %v773_v51 = vpop.f32.mrf.mxu1  ;;  %v522_v53 = vadd.f32 %v521_v52, %v300_v48 }
 0x15b   :  { %v523_v55 = vpop.f32.mrf.mxu0  ;;  %v774_v63 = vadd.f32 %v773_v51, %v2733_v56 }
 0x15c   :  { %v2730_v54 = vpop.f32.mrf.mxu1  ;;  %v540_v57 = vmul.f32 0.088388346, %v522_v53  ;;  %v2735_v58 = vadd.f32 %v523_v55, %v304_v49 }
 0x15d   :  { %v525_v60 = vpop.f32.mrf.mxu0 }
 0x15e   :  { %v777_v59 = vpop.f32.mrf.mxu1  ;;  %2106 = vmatprep.mubr.f32.mxu0 %v540_v57  ;;  %v526_v2 = vadd.f32 %v525_v60, %v300_v48 }
 0x15f   :  { %v778_v61 = vadd.f32 %v777_v59, %v2733_v56  ;;  %v527_v62 = vpop.f32.mrf.mxu0 }
 0x160   :  { %v2739_v0 = vadd.f32 %v527_v62, %v304_v49  ;;  %v542_v7 = vmul.f32 0.088388346, %v526_v2  ;;  %v779_v19 = vpop.f32.mrf.mxu1 }
 0x161   :  { %2102 = vmatprep.subr.mxu0 %v778_v61  ;;  %v531_v1 = vpop.f32.mrf.mxu0  ;;  %v780_v25 = vadd.f32 %v779_v19, %v2758_v21 }
 0x162   :  { %2103 = vmatpush3.xpose.msra.mxu0 %v778_v61  ;;  %v2741_v3 = vadd.f32 %v531_v1, %v300_v48  ;;  %v776_v1 = vadd.f32 %v2730_v54, %v2758_v21  ;;  %v543_v2 = vmul.f32 0.088388346, %v2739_v0 }
 0x163   :  { %2104 = vmatprep.subr.mxu0 %v774_v63  ;;  %v533_v4 = vpop.f32.mrf.mxu0 }
 0x164   :  { %v2743_v5 = vadd.f32 %v533_v4, %v304_v49 }
 0x165   :  { %v535_v6 = vpop.f32.mrf.mxu0 }
 0x166   :  { %2105 = vmatpush3.xpose.msra.mxu0 %v774_v63  ;;  %v2745_v8 = vadd.f32 %v535_v6, %v300_v48  ;;  %v541_v63 = vmul.f32 0.088388346, %v2735_v58 }
 0x167   :  { %2109 = vmatprep.subr.bf16.mxu0 %v2601_v42  ;;  %v537_v9 = vpop.f32.mrf.mxu0 }
 0x168   :  { %v2748_v10 = vadd.f32 %v537_v9, %v304_v49 }
 0x169   :  { %2107 = vmatmul.mubr.f32.vlgmr.msra.gmra.mxu0 %v542_v7 }
 0x16a   :  { %2111 = vmatprep.mubr.msk.bf16.mxu0 %vm2602_vm2, %v2601_v42 }
 0x199   :  { %v1017_v14 = vpop.f32.mrf.mxu0 }
 0x19a   :  { %v1018_v16 = vadd.f32 %v1017_v14, %v796_v12  ;;  %v783_v14 = vpop.f32.mrf.mxu1 }
 0x19b   :  { %v1019_v15 = vpop.f32.mrf.mxu0 }
 0x19c   :  { %v2755_v17 = vadd.f32 %v1019_v15, %v800_v13  ;;  %v785_v15 = vpop.f32.mrf.mxu1 }
 0x19d   :  { %v1021_v18 = vpop.f32.mrf.mxu0 }
 0x19e   :  { %v1022_v20 = vadd.f32 %v1021_v18, %v796_v12 }
 0x19f   :  { %v1023_v22 = vpop.f32.mrf.mxu0 }
 0x1a0   :  { %v1036_v23 = vpack.c.bf16 %v1022_v20, %v1018_v16  ;;  %v1024_v24 = vadd.f32 %v1023_v22, %v800_v13  ;;  %v787_v16 = vpop.f32.mrf.mxu1 }
 0x1a1   :  { %v1027_v26 = vpop.f32.mrf.mxu0 }
 0x1a2   :  { %2110 = vmatpush3.bf16.msra.mxu0 %v1036_v23  ;;  %v1037_v27 = vpack.c.bf16 %v1024_v24, %v2755_v17  ;;  %v1028_v29 = vadd.f32 %v1027_v26, %v796_v12  ;;  %v788_v17 = vadd.f32 %v787_v16, %v2733_v56  ;;  %v789_v18 = vpop.f32.mrf.mxu1 }
 0x1a3   :  { %2115 = vmatprep.subr.mxu0 %v780_v25  ;;  %v1029_v28 = vpop.f32.mrf.mxu0  ;;  %v790_v19 = vadd.f32 %v789_v18, %v2758_v21 }
 0x1a4   :  { %v2762_v30 = vadd.f32 %v1029_v28, %v800_v13 }
 0x1a5   :  { %v1031_v31 = vpop.f32.mrf.mxu0 }
 0x1a6   :  { %v1032_v32 = vadd.f32 %v1031_v31, %v796_v12  ;;  %v544_v31 = vmul.f32 0.088388346, %v2741_v3 }
 0x1a7   :  { %v1033_v33 = vpop.f32.mrf.mxu0 }
 0x1a8   :  { %v1038_v34 = vpack.c.bf16 %v1032_v32, %v1028_v29  ;;  %v2764_v35 = vadd.f32 %v1033_v33, %v800_v13  ;;  %v784_v32 = vadd.f32 %v783_v14, %v2733_v56  ;;  %v546_v33 = vmul.f32 0.088388346, %v2745_v8 }
 0x1a9   :  { %v1336_v56 = vsel %vm1335_vm3, -1e+09, %v2601_v42 }
 0x1aa   :  { %v1039_v36 = vpack.c.bf16 %v2764_v35, %v2762_v30  ;;  %2136 = vmatpush3.bf16.msra.mxu1 %v1038_v34 }
 0x1ab   :  { %2141 = vmatprep.subr.mxu1 %v790_v19 }
 0x229   :  { %v2108_v39 = vpop.f32.mrf.mxu0 }
 0x22a   :  { %v1119_v45 = vadd.f32 %v2108_v39, %v1046_v40 }
 0x22b   :  { %v1113_v41 = vpop.f32.mrf.mxu0 }
 0x22c   :  { %v1114_v44 = vadd.f32 %v1113_v41, %v1046_v40  ;;  %v1126_v49 = vsel %vm1122_vm1, %v1119_v45, -inf }
 0x22e   :  { %v1123_v48 = vsel %vm1122_vm1, %v1114_v44, -inf }
 0x22f   :  { %1124 = vmax.xlane.f32.xlu0 %v1123_v48 }
 0x233   :  { %1127 = vmax.xlane.f32.xlu0 %v1126_v49 }
 0x2b8   :  { %v1125_v51 = vpop.xlane.xlu0 %1124 }
 0x2b9   :  { %v1129_v52 = vsub.f32 %v1114_v44, %v1125_v51 }
 0x2bb   :  { %v1131_v53 = vmul.f32 1.442695, %v1129_v52 }
 0x2bc   :  { %v1128_v55 = vpop.xlane.xlu0 %1127 }
 0x2bd   :  { %v1130_v57 = vsub.f32 %v1119_v45, %v1128_v55  ;;  %2379 = vpow2.f32 %v1131_v53 }
 0x2bf   :  { %v1133_v59 = vmul.f32 1.442695, %v1130_v57 }
 0x2c1   :  { %2381 = vpow2.f32 %v1133_v59 }
 0x2ca   :  { %v2779_v60 = vpop.eup %2379 }
 0x2ce   :  { %v2781_v61 = vpop.eup %2381 }
 0x2cf   :  { %v1141_v62 = vpack.c.bf16 %v2781_v61, %v2779_v60  ;;  %v1138_v35 = vsel %vm1122_vm1, %v2781_v61, 0.0 }
 0x2d1   :  { %2112 = vmatmul.mubr.msk.bf16.vlgmr.msra.gmra.mxu0 %vm1122_vm1, %v1141_v62  ;;  %v545_v62 = vmul.f32 0.088388346, %v2743_v5 }
 0x2d2   :  { %2116 = vmatpush3.xpose.msra.mxu0 %v780_v25  ;;  %2119 = vmatprep.mubr.f32.mxu0 %v541_v63  ;;  %v786_v63 = vadd.f32 %v785_v15, %v2758_v21 }
 0x2d3   :  { %2117 = vmatprep.subr.mxu0 %v776_v1 }
 0x2d6   :  { %2118 = vmatpush3.xpose.msra.mxu0 %v776_v1  ;;  %v547_v1 = vmul.f32 0.088388346, %v2748_v10 }
 0x2d7   :  { %2122 = vmatprep.subr.bf16.mxu0 %v2601_v42 }
 0x2d9   :  { %2120 = vmatmul.mubr.f32.vlgmr.msra.gmra.mxu0 %v543_v2 }
 0x2da   :  { %2123 = vmatpush3.bf16.msra.mxu0 %v1037_v27  ;;  %2124 = vmatprep.mubr.msk.bf16.mxu0 %vm2602_vm2, %v2601_v42 }
 0x2db   :  { %2128 = vmatprep.subr.mxu0 %v788_v17 }
 0x391   :  { %v2793_v4 = vpop.f32.mrf.mxu0 }
 0x393   :  { %v2113_v58 = vpop.f32.mrf.mxu0 }
 0x395   :  { %v2795_v6 = vpop.f32.mrf.mxu0 }
 0x397   :  { %v2114_v54 = vpop.f32.mrf.mxu0 }
 0x399   :  { %v2121_v7 = vpop.f32.mrf.mxu0 }
 0x39a   :  { %v1262_v12 = vadd.f32 %v2121_v7, %v1046_v40 }
 0x39b   :  { %v1256_v9 = vpop.f32.mrf.mxu0 }
 0x39c   :  { %v1257_v11 = vadd.f32 %v1256_v9, %v1046_v40  ;;  %v1268_v0 = vsel %vm1122_vm1, %v1262_v12, -inf }
 0x39e   :  { %v1265_v13 = vsel %vm1122_vm1, %v1257_v11, -inf }
 0x39f   :  { %1266 = vmax.xlane.f32.xlu1 %v1265_v13  ;;  %v2333_v13 = vld [vmem:[#allocation16 + $0x74] ss:$8 sps:$4 sm:$0xff]  }
 0x3a3   :  { %1269 = vmax.xlane.f32.xlu1 %v1268_v0 }
 0x428   :  { %v1267_v20 = vpop.xlane.xlu1 %1266 }
 0x429   :  { %v1271_v22 = vsub.f32 %v1257_v11, %v1267_v20 }
 0x42b   :  { %v1273_v23 = vmul.f32 1.442695, %v1271_v22 }
 0x42c   :  { %v1270_v24 = vpop.xlane.xlu1 %1269 }
 0x42d   :  { %v1272_v25 = vsub.f32 %v1262_v12, %v1270_v24  ;;  %2383 = vpow2.f32 %v1273_v23  ;;  %v2331_v24 = vld [vmem:[#allocation16 + $0x70] ss:$8 sps:$4 sm:$0xff]  }
 0x42f   :  { %v1275_v26 = vmul.f32 1.442695, %v1272_v25 }
 0x431   :  { %2385 = vpow2.f32 %v1275_v26 }
 0x43a   :  { %v2801_v27 = vpop.eup %2383 }
 0x43e   :  { %v2386_v28 = vpop.eup %2385 }
 0x43f   :  { %v1283_v29 = vpack.c.bf16 %v2386_v28, %v2801_v27  ;;  %v1280_v30 = vsel %vm1122_vm1, %v2386_v28, 0.0  ;;  %v2336_v28 = vld [vmem:[#allocation16 + $0x64] ss:$8 sps:$4 sm:$0xff]  }
 0x441   :  { %2125 = vmatmul.mubr.msk.bf16.vlgmr.msra.gmra.mxu0 %vm1122_vm1, %v1283_v29 }
 0x442   :  { %2129 = vmatpush3.xpose.msra.mxu0 %v788_v17  ;;  %2132 = vmatprep.mubr.f32.mxu0 %v544_v31 }
 0x443   :  { %2130 = vmatprep.subr.mxu0 %v784_v32 }
 0x446   :  { %2131 = vmatpush3.xpose.msra.mxu0 %v784_v32 }
 0x449   :  { %2133 = vmatmul.mubr.f32.vlgmr.msra.gmra.mxu0 %v546_v33 }
 0x501   :  { %v2808_v34 = vpop.f32.mrf.mxu0 }
 0x503   :  { %v2126_v39 = vpop.f32.mrf.mxu0 }
 0x505   :  { %v2811_v40 = vpop.f32.mrf.mxu0 }
 0x507   :  { %v2127_v3 = vpop.f32.mrf.mxu0 }
 0x508   :  { %v2339_v3 = vld [vmem:[#allocation16 + $0x54] ss:$8 sps:$4 sm:$0xff]  }
 0x509   :  { %v2134_v41 = vpop.f32.mrf.mxu0 }
 0x50a   :  { %v1409_v44 = vadd.f32 %v2134_v41, %v1336_v56  ;;  %v2345_v41 = vld [vmem:[#allocation16 + $0x34] ss:$8 sps:$4 sm:$0xff]  }
 0x50b   :  { %v1403_v45 = vpop.f32.mrf.mxu0 }
 0x50c   :  { %v1404_v48 = vadd.f32 %v1403_v45, %v1336_v56  ;;  %v1415_v49 = vsel %vm1122_vm1, %v1409_v44, -inf  ;;  %v2348_v45 = vld [vmem:[#allocation16 + $0x24] ss:$8 sps:$4 sm:$0xff]  }
 0x50d   :  { %1416 = vmax.xlane.f32.xlu1 %v1415_v49  ;;  %v2351_v49 = vld [vmem:[#allocation16 + $0x14] ss:$8 sps:$4 sm:$0xff]  }
 0x50e   :  { %v1412_v8 = vsel %vm1122_vm1, %v1404_v48, -inf }
 0x50f   :  { %1413 = vmax.xlane.f32.xlu0 %v1412_v8  ;;  %v2349_v8 = vld [vmem:[#allocation16 + $0x10] ss:$8 sps:$4 sm:$0xff]  }
 0x596   :  { %v1417_v43 = vpop.xlane.xlu1 %1416 }
 0x597   :  { %v1419_v50 = vsub.f32 %v1409_v44, %v1417_v43  ;;  %v2343_v44 = vld [vmem:[#allocation16 + $0x30] ss:$8 sps:$4 sm:$0xff]   ;;  %v2354_v43 = vld [vmem:[#allocation16 + $0x4] ss:$8 sps:$4 sm:$0xff]  }
 0x598   :  { %v1414_v51 = vpop.xlane.xlu0 %1413 }
 0x599   :  { %v1422_v52 = vmul.f32 1.442695, %v1419_v50  ;;  %v1418_v37 = vsub.f32 %v1404_v48, %v1414_v51  ;;  %v2346_v48 = vld [vmem:[#allocation16 + $0x20] ss:$8 sps:$4 sm:$0xff]   ;;  %v2357_v51 = vld [vmem:[#allocation16 + $0xf4] ss:$8 sps:$4 sm:$0xff]  }
 0x59a   :  { %v2352_v50 = vld [vmem:[#allocation16] ss:$8 sps:$4 sm:$0xff]  }
 0x59b   :  { %v1420_v53 = vmul.f32 1.442695, %v1418_v37  ;;  %2387 = vpow2.f32 %v1422_v52  ;;  %v2355_v52 = vld [vmem:[#allocation16 + $0xf0] ss:$8 sps:$4 sm:$0xff]   ;;  %v2360_v37 = vld [vmem:[#allocation16 + $0xe4] ss:$8 sps:$4 sm:$0xff]  }
 0x59d   :  { %2389 = vpow2.f32 %v1420_v53  ;;  %v2358_v53 = vld [vmem:[#allocation16 + $0xe0] ss:$8 sps:$4 sm:$0xff]  }
 0x5a8   :  { %v2816_v55 = vpop.eup %2387 }
 0x5a9   :  { %v1427_v32 = vsel %vm1122_vm1, %v2816_v55, 0.0 }
 0x5aa   :  { %v2818_v57 = vpop.eup %2389 }
 0x5ab   :  { %v1430_v59 = vpack.c.bf16 %v2816_v55, %v2818_v57  ;;  %v1424_v39 = vsel %vm1122_vm1, %v2818_v57, 0.0  ;;  %v2363_v55 = vld [vmem:[#allocation16 + $0xd4] ss:$8 sps:$4 sm:$0xff]   ;;  %v2361_v57 = vld [vmem:[#allocation16 + $0xd0] ss:$8 sps:$4 sm:$0xff]  }
 0x5ad   :  { %2138 = vmatmul.mubr.msk.bf16.vlgmr.msra.gmra.mxu1 %vm1122_vm1, %v1430_v59  ;;  %v2366_v59 = vld [vmem:[#allocation16 + $0xc4] ss:$8 sps:$4 sm:$0xff]  }
 0x5ae   :  { %2142 = vmatpush3.xpose.msra.mxu1 %v790_v19  ;;  %2145 = vmatprep.mubr.f32.mxu1 %v545_v62 }
 0x5af   :  { %2143 = vmatprep.subr.mxu1 %v786_v63 }
 0x5b2   :  { %2144 = vmatpush3.xpose.msra.mxu1 %v786_v63 }
 0x5b3   :  { %2148 = vmatprep.subr.bf16.mxu1 %v2601_v42 }
 0x5b5   :  { %2146 = vmatmul.mubr.f32.vlgmr.msra.gmra.mxu1 %v547_v1  ;;  %v2364_v1 = vld [vmem:[#allocation16 + $0xc0] ss:$8 sps:$4 sm:$0xff]  }
 0x5b6   :  { %2149 = vmatpush3.bf16.msra.mxu1 %v1039_v36  ;;  %2150 = vmatprep.mubr.msk.bf16.mxu1 %vm2602_vm2, %v2601_v42  ;;  %v1277_v42 = vsel %vm1122_vm1, %v2801_v27, 0.0  ;;  %v1135_v36 = vsel %vm1122_vm1, %v2779_v60, 0.0 }
 0x5b7   :  { %1805 = vmatprep.subr.bf16.mxu1 %v2333_v13 }
 0x66d   :  { %v2832_v5 = vpop.f32.mrf.mxu1 }
 0x66f   :  { %v2139_v21 = vpop.f32.mrf.mxu1 }
 0x670   :  { %v2369_v21 = vld [vmem:[#allocation16 + $0xb4] ss:$8 sps:$4 sm:$0xff]  }
 0x671   :  { %v2834_v2 = vpop.f32.mrf.mxu1 }
 0x673   :  { %v2140_v58 = vpop.f32.mrf.mxu1 }
 0x674   :  { %v2367_v58 = vld [vmem:[#allocation16 + $0xb0] ss:$8 sps:$4 sm:$0xff]  }
 0x675   :  { %v2147_v54 = vpop.f32.mrf.mxu1 }
 0x676   :  { %v1551_v7 = vadd.f32 %v2147_v54, %v1336_v56  ;;  %v2372_v54 = vld [vmem:[#allocation16 + $0xa4] ss:$8 sps:$4 sm:$0xff]  }
 0x677   :  { %v1545_v9 = vpop.f32.mrf.mxu1 }
 0x678   :  { %v1546_v10 = vadd.f32 %v1545_v9, %v1336_v56  ;;  %v1557_v11 = vsel %vm1122_vm1, %v1551_v7, -inf  ;;  %v2340_v56 = vld [vmem:[#allocation16 + $0x40] ss:$8 sps:$4 sm:$0xff]   ;;  %v2375_v9 = vld [vmem:[#allocation16 + $0x94] ss:$8 sps:$4 sm:$0xff]  }
 0x679   :  { %1558 = vmax.xlane.f32.xlu1 %v1557_v11  ;;  %v2378_v11 = vld [vmem:[#allocation16 + $0x84] ss:$8 sps:$4 sm:$0xff]  }
 0x67a   :  { %v1554_v12 = vsel %vm1122_vm1, %v1546_v10, -inf }
 0x67b   :  { %1555 = vmax.xlane.f32.xlu0 %v1554_v12 }
 0x67d   :  { %1281 = vadd.xlane.f32.xlu1 %v1280_v30 }
 0x67f   :  { %1278 = vadd.xlane.f32.xlu0 %v1277_v42  ;;  %v2376_v42 = vld [vmem:[#allocation16 + $0x80] ss:$8 sps:$4 sm:$0xff]  }
 0x681   :  { %1139 = vadd.xlane.f32.xlu1 %v1138_v35 }
 0x683   :  { %1136 = vadd.xlane.f32.xlu0 %v1135_v36 }
 0x702   :  { %v1559_v0 = vpop.xlane.xlu1 %1558 }
 0x703   :  { %v1561_v14 = vsub.f32 %v1551_v7, %v1559_v0  ;;  %v2370_v7 = vld [vmem:[#allocation16 + $0xa0] ss:$8 sps:$4 sm:$0xff]  }
 0x704   :  { %v1556_v15 = vpop.xlane.xlu0 %1555 }
 0x705   :  { %v1564_v16 = vmul.f32 1.442695, %v1561_v14  ;;  %v1560_v17 = vsub.f32 %v1546_v10, %v1556_v15  ;;  %v2373_v10 = vld [vmem:[#allocation16 + $0x90] ss:$8 sps:$4 sm:$0xff]  }
 0x706   :  { %v1282_v18 = vpop.xlane.xlu1 %1281 }
 0x707   :  { %2391 = vpow2.f32 %v1564_v16  ;;  %v1562_v19 = vmul.f32 1.442695, %v1560_v17 }
 0x708   :  { %2393 = vrcp.f32 %v1282_v18  ;;  %v1279_v20 = vpop.xlane.xlu0 %1278 }
 0x709   :  { %2395 = vpow2.f32 %v1562_v19 }
 0x70a   :  { %2397 = vrcp.f32 %v1279_v20  ;;  %v1140_v63 = vpop.xlane.xlu1 %1139 }
 0x70c   :  { %v1137_v62 = vpop.xlane.xlu0 %1136 }
 0x70d   :  { %2399 = vrcp.f32 %v1137_v62 }
 0x70e   :  { %2401 = vrcp.f32 %v1140_v63 }
 0x714   :  { %v2392_v61 = vpop.eup %2391 }
 0x715   :  { %v2394_v22 = vpop.eup %2393  ;;  %v1569_v23 = vsel %vm1122_vm1, %v2392_v61, 0.0 }
 0x716   :  { %v2396_v60 = vpop.eup %2395  ;;  %1570 = vadd.xlane.f32.xlu1 %v1569_v23  ;;  %v1331_v31 = vmul.f32 %v2394_v22, %v2811_v40  ;;  %v2342_v40 = vld [vmem:[#allocation16 + $0x44] ss:$8 sps:$4 sm:$0xff]  }
 0x717   :  { %v2398_v25 = vpop.eup %2397  ;;  %v1566_v26 = vsel %vm1122_vm1, %v2396_v60, 0.0  ;;  %v1572_v27 = vpack.c.bf16 %v2392_v61, %v2396_v60 }
 0x718   :  { %1567 = vadd.xlane.f32.xlu0 %v1566_v26  ;;  %v1330_v29 = vmul.f32 %v2398_v25, %v2808_v34  ;;  %v2337_v34 = vld [vmem:[#allocation16 + $0x50] ss:$8 sps:$4 sm:$0xff]  }
 0x719   :  { %2151 = vmatmul.mubr.msk.bf16.vlgmr.msra.gmra.mxu1 %vm1122_vm1, %v1572_v27 }
 0x71a   :  { %1806 = vmatpush1.bf16.msra.mxu1 %v2331_v24  ;;  %1428 = vadd.xlane.f32.xlu1 %v1427_v32  ;;  %v1642_v33 = vpack.c.bf16 %v1331_v31, %v1330_v29  ;;  %v2400_v12 = vpop.eup %2399 }
 0x71b   :  { %1807 = vmatprep.subr.bf16.mxu1 %v2336_v28  ;;  %v2402_v30 = vpop.eup %2401  ;;  %v1188_v35 = vmul.f32 %v2400_v12, %v2793_v4  ;;  %v1885_v28 = vld [vmem:[%s2877_s11] sm:$0x3]  ;;  %s2603_s11 = smov [#allocation17]  }
 0x71c   :  { %1837 = vmatprep.mubr.bf16.mxu1 %v1642_v33  ;;  %1425 = vadd.xlane.f32.xlu0 %v1424_v39  ;;  %v1189_v36 = vmul.f32 %v2402_v30, %v2795_v6  ;;  %v1890_v29 = vrot.slane %v1885_v28, %v2721_v46  ;;  %v1894_v31 = vrot.slane %v1885_v28, %v2723_v47  ;;  %s1918_s22 = sshll.u32 %s2603_s11, 4  ;;  %s1919_s22 = int_to_ptr.vmem [resolvable:$true] %s1918_s22 }
 0x71d   :  { %s2559_s4 = scalar_lea.vmem %s1919_s22, 1024  ;;  %p2564_p8 = scmp.lt.s32.totalorder %s1919_s22, %s1919_s22 }
 0x71e   :  { %1808 = vmatpush1.bf16.msra.mxu1 %v2334_v38  ;;  %v1641_v13 = vpack.c.bf16 %v1189_v36, %v1188_v35  ;;  %p2560_p7 = scmp.ne.s32.totalorder %s1919_s22, %s2559_s4  ;;  %p2565_p9 = scmp.lt.s32.totalorder %s2559_s4, %s2559_s4 }
 0x71f   :  { %1809 = vmatprep.subr.bf16.mxu1 %v2339_v3 }
 0x720   :  { %p2566_p10 = por %p2565_p9, %p2564_p8 }
 0x722   :  { %1810 = vmatpush1.bf16.msra.mxu1 %v2337_v34  ;;  %p2567_p11 = pnand %p2566_p10, %p2560_p7 }
 0x723   :  { %1811 = vmatprep.subr.bf16.mxu1 %v2342_v40 }
 0x726   :  { %1812 = vmatpush1.bf16.msra.mxu1 %v2340_v56 }
 0x727   :  { %1813 = vmatprep.subr.bf16.mxu1 %v2345_v41 }
 0x72a   :  { %1814 = vmatpush1.bf16.msra.mxu1 %v2343_v44 }
 0x72b   :  { %1815 = vmatprep.subr.bf16.mxu1 %v2348_v45 }
 0x72e   :  { %1816 = vmatpush1.bf16.msra.mxu1 %v2346_v48 }
 0x72f   :  { %1817 = vmatprep.subr.bf16.mxu1 %v2351_v49 }
 0x732   :  { %1818 = vmatpush1.bf16.msra.mxu1 %v2349_v8 }
 0x733   :  { %1819 = vmatprep.subr.bf16.mxu1 %v2354_v43 }
 0x736   :  { %1820 = vmatpush1.bf16.msra.mxu1 %v2352_v50 }
 0x737   :  { %1821 = vmatprep.subr.bf16.mxu1 %v2357_v51 }
 0x73a   :  { %1822 = vmatpush2.bf16.msra.mxu1 %v2355_v52 }
 0x73b   :  { %1823 = vmatprep.subr.bf16.mxu1 %v2360_v37 }
 0x73e   :  { %1824 = vmatpush2.bf16.msra.mxu1 %v2358_v53 }
 0x73f   :  { %1825 = vmatprep.subr.bf16.mxu1 %v2363_v55 }
 0x742   :  { %1826 = vmatpush2.bf16.msra.mxu1 %v2361_v57 }
 0x743   :  { %1827 = vmatprep.subr.bf16.mxu1 %v2366_v59 }
 0x746   :  { %1828 = vmatpush2.bf16.msra.mxu1 %v2364_v1 }
 0x747   :  { %1829 = vmatprep.subr.bf16.mxu1 %v2369_v21 }
 0x74a   :  { %1830 = vmatpush2.bf16.msra.mxu1 %v2367_v58 }
 0x74b   :  { %1831 = vmatprep.subr.bf16.mxu1 %v2372_v54 }
 0x74e   :  { %1832 = vmatpush2.bf16.msra.mxu1 %v2370_v7 }
 0x74f   :  { %1833 = vmatprep.subr.bf16.mxu1 %v2375_v9 }
 0x752   :  { %1834 = vmatpush2.bf16.msra.mxu1 %v2373_v10 }
 0x753   :  { %1835 = vmatprep.subr.bf16.mxu1 %v2378_v11 }
 0x756   :  { %1836 = vmatpush2.bf16.msra.mxu1 %v2376_v42 }
 0x759   :  { %1838 = vmatmul.mubr.bf16.vlgmr.msra.gmra.mxu1 %v1641_v13 }
 0x79f   :  { %v1571_v14 = vpop.xlane.xlu1 %1570 }
 0x7a1   :  { %v1568_v0 = vpop.xlane.xlu0 %1567 }
 0x7a3   :  { %v1429_v16 = vpop.xlane.xlu1 %1428 }
 0x7a5   :  { %v1426_v15 = vpop.xlane.xlu0 %1425 }
 0x7a6   :  { %2403 = vrcp.f32 %v1426_v15 }
 0x7a7   :  { %2405 = vrcp.f32 %v1571_v14 }
 0x7a8   :  { %2407 = vrcp.f32 %v1429_v16 }
 0x7a9   :  { %2409 = vrcp.f32 %v1568_v0 }
 0x7b3   :  { %v2404_v18 = vpop.eup %2403 }
 0x7b4   :  { %v2406_v19 = vpop.eup %2405  ;;  %v1477_v6 = vmul.f32 %v2404_v18, %v2832_v5 }
 0x7b5   :  { %v2408_v61 = vpop.eup %2407 }
 0x7b6   :  { %v2410_v22 = vpop.eup %2409  ;;  %v1478_v25 = vmul.f32 %v2408_v61, %v2834_v2 }
 0x7b8   :  { %v1643_v27 = vpack.c.bf16 %v1478_v25, %v1477_v6 }
 0x7d9   :  { %v1610_v17 = vpop.f32.mrf.mxu1 }
 0x7da   :  { %v1619_v23 = vmul.f32 %v2410_v22, %v1610_v17 }
 0x7db   :  { %v2152_v20 = vpop.f32.mrf.mxu1 }
 0x7dd   :  { %v1613_v4 = vpop.f32.mrf.mxu1 }
 0x7de   :  { %v1620_v60 = vmul.f32 %v2406_v19, %v1613_v4 }
 0x7df   :  { %v2153_v24 = vpop.f32.mrf.mxu1 }
 0x7e0   :  { %v1644_v26 = vpack.c.bf16 %v1620_v60, %v1619_v23 }
 0x7e2   :  { %1847 = vmatprep.mubr.bf16.mxu1 %v1644_v26 }
 0x7e3   :  { %1848 = vmatmul.mubr.bf16.gmra.mxu1 %v1643_v27 }
 0x819   :  { %v1839_v32 = vpop.f32.mrf.mxu1 }
 0x81a   :  { %v1897_v33 = vadd.f32 %v1890_v29, %v1839_v32 }
 0x81b   :  { %v1841_v5 = vpop.f32.mrf.mxu1 }
 0x81c   :  { %1905 = vst [vmem:[#allocation17] sm:$0xff] %v1897_v33  ;;  %v1898_v38 = vadd.f32 %v1894_v31, %v1841_v5 }
 0x81d   :  { %v1843_v39 = vpop.f32.mrf.mxu1 }
 0x81e   :  { %1906 = vst [vmem:[#allocation17 + $0x8] sm:$0xff] %v1898_v38  ;;  %v1899_v2 = vadd.f32 %v1890_v29, %v1843_v39 }
 0x81f   :  { %v1845_v3 = vpop.f32.mrf.mxu1 }
 0x820   :  { %1907 = vst [vmem:[#allocation17 + $0x10] sm:$0xff] %v1899_v2  ;;  %v1900_v34 = vadd.f32 %v1894_v31, %v1845_v3 }
 0x822   :  { %1908 = vst [vmem:[#allocation17 + $0x18] sm:$0xff] %v1900_v34 }
 0x8a3   :  { %v1849_v40 = vpop.f32.mrf.mxu1 }
 0x8a4   :  { %v1901_v56 = vadd.f32 %v1890_v29, %v1849_v40 }
 0x8a5   :  { %v1851_v41 = vpop.f32.mrf.mxu1 }
 0x8a6   :  { %1909 = vst [vmem:[#allocation17 + $0x20] sm:$0xff] %v1901_v56  ;;  %v1902_v44 = vadd.f32 %v1894_v31, %v1851_v41 }
 0x8a7   :  { %v1853_v46 = vpop.f32.mrf.mxu1 }
 0x8a8   :  { %1910 = vst [vmem:[#allocation17 + $0x28] sm:$0xff] %v1902_v44  ;;  %v1903_v47 = vadd.f32 %v1890_v29, %v1853_v46 }
 0x8a9   :  { %v1855_v45 = vpop.f32.mrf.mxu1 }
 0x8aa   :  { %1911 = vst [vmem:[#allocation17 + $0x30] sm:$0xff] %v1903_v47  ;;  %v1904_v48 = vadd.f32 %v1894_v31, %v1855_v45 }
 0x8ac   :  { %1912 = vst [vmem:[#allocation17 + $0x38] sm:$0xff] %v1904_v48 }
 0x8ad   :  { %2570 = shalt.err (!%p2567_p11)
}
 0x8ae   :  { %s2604_s23 = smov 256   ;;  %s2605_s24 = smov 16  }
 0x8af   :  { %1924 = dma.vmem_to_hbm [thread:$0]  %s1919_s22, 1024, %s2878_s12, [#allocation7], %s2604_s23, %s2604_s23, %s2605_s24  }
 0x8b0   :  { %2589 = dma.done.wait [#allocation7], 1024  }
 0x8b1   :  { %2590 = vsyncadd [#allocation7], 4294966272 }
 0x8b2   :  { %1928 = vsyncpa [#allocation6], 1 }
 0x8b3   :  { %1929 = vsyncpa [#allocation9], 1 }
 0x8b4   :  { %1930 = vsyncpa [#allocation12], 1 }
 0x8b5   :  { %1931 = vsyncpa [#allocation15], 1 }
 0x8b6   :  { %1932 = vsyncpa [#allocation7], 1 }

</bundles_post_ra>
